<compile_context>
chip_gen: v7x
topology: tpu7x:2x2x1
jax: 0.10.0
libtpu: 0.0.40
codegen_flags: <defaults>
</compile_context>

<pallas_src>
import functools

import jax
import jax.numpy as jnp
from jax.experimental import pallas as pl
from jax.experimental.pallas import tpu as pltpu


def _sigmoid(x):
    # Exact sigmoid — gate tensors are tiny and off the critical path.
    return 1.0 / (1.0 + jnp.exp(-x))


def _choose_h_tile(ut, H, WC, budget=2 << 20):
    """Largest H-tile (multiple of 8, dividing H) with an input block <= ~budget."""
    if H % 8 != 0:
        return H                      # keep full H (sublane tiling constraint)
    row_bytes = ut * WC * 4
    th = max(8, min(H, (budget // max(row_bytes, 1)) // 8 * 8))
    while H % th != 0:
        th -= 8
    return th


def _choose_row_tile(N, H, WC, budget=2 << 20, min_steps=8):
    """Rows per Kernel-B block: ~budget bytes per block and >= min_steps grid steps."""
    row_bytes = H * WC * 4
    bn = max(1, min(N, budget // max(row_bytes, 1)))
    bn = min(bn, max(1, N // min_steps))
    while N % bn != 0:
        bn -= 1
    return bn


def _block_diag_taps(w_convu, W):
    """(3, C, C) conv_u tap weights -> (3, W*C, W*C) block-diagonal matrices.

    Keeps the conv matmul in the lane-dense W*C layout (K = N = W*C, good MXU
    shape when C < 128); the extra zero FLOPs are free in this mem-bound regime.
    For very large W*C (production C >= 128) fall back to per-tap (C, C) matmuls.
    """
    k3, C, _ = w_convu.shape
    eye_w = jnp.eye(W, dtype=w_convu.dtype)
    wd = jnp.einsum('ij,kab->kiajb', eye_w, w_convu)     # (3, W, C, W, C)
    return wd.reshape(k3, W * C, W * C)


# ---------------------------------------------------------------------------
# Kernel A: H-tiled global avg-pool + full gate computation (x1 * x2)
# ---------------------------------------------------------------------------
def pool_gate(x_base, p, *, b, u, t):
    """x_base: (N, H, W*C) lane-dense rows, N = b*u*t.  Returns gate (b, u*t, C)."""
    N, H, WC = x_base.shape
    C = p['w1x1'].shape[0]
    C2 = p['w_sma3'].shape[0]
    W = WC // C
    ut = u * t
    assert N == b * ut and u >= 2
    th = _choose_h_tile(ut, H, WC)
    nh = H // th
    inv_hw = 1.0 / float(H * W)

    def kernel(x_ref, w31_ref, s1_ref, b1_ref, w11_ref,
               ws1_ref, ss_ref, sb_ref, ws2_ref, ws3_ref, o_ref, acc_ref):
        h = pl.program_id(1)

        @pl.when(h == 0)
        def _init():
            acc_ref[...] = jnp.zeros_like(acc_ref)

        # Lane-dense partial pooling: sum over the H-tile, keep W*C lanes.
        acc_ref[...] += jnp.sum(x_ref[...], axis=1)               # (ut, WC)

        @pl.when(h == nh - 1)
        def _finalize():
            # finish the avg-pool: tiny (ut, W, C) tail reduce over W
            pooled = jnp.sum(acc_ref[...].reshape(ut, W, C), axis=1) * inv_hw
            feat = pooled.reshape(u, t, C)

            # --- x1 branch: conv3x1 along u (pad 1) + BN1 + conv1x1 + sigmoid
            zu = jnp.zeros((1, t, C), jnp.float32)
            fp = jnp.concatenate([zu, feat, zu], axis=0)          # (u+2, t, C)
            x1p = jnp.zeros((ut, C), jnp.float32)
            for k in range(3):
                x1p = x1p + jnp.dot(fp[k:k + u].reshape(ut, C), w31_ref[k],
                                    preferred_element_type=jnp.float32)
            x1p = x1p * s1_ref[...] + b1_ref[...]
            x1 = _sigmoid(jnp.dot(x1p, w11_ref[...],
                                  preferred_element_type=jnp.float32))
            x1 = x1.reshape(u, t, C)

            # --- InterSMA branch: 1x1 (C->C/2) + BN + ReLU
            y = jnp.dot(pooled, ws1_ref[...],
                        preferred_element_type=jnp.float32)
            y = jnp.maximum(y * ss_ref[...] + sb_ref[...], 0.0)   # (ut, C2)
            yb = y.reshape(u, t, C2)

            # conv2 along t (kernel 3, pad 1, channel-mixing), every u
            zt = jnp.zeros((u, 1, C2), jnp.float32)
            yp = jnp.concatenate([zt, yb, zt], axis=1)            # (u, t+2, C2)
            cy = jnp.zeros((ut, C2), jnp.float32)
            for k in range(3):
                cy = cy + jnp.dot(yp[:, k:k + t].reshape(ut, C2), ws2_ref[k],
                                  preferred_element_type=jnp.float32)
            cy = cy.reshape(u, t, C2)

            # diff_u  = mean_i( y[i]   - conv2(y[i+1]) )
            # diff_u2 = mean_i( y[i+1] - conv2(y[i])   ) ; average the two
            d1 = jnp.mean(yb[:u - 1], axis=0) - jnp.mean(cy[1:], axis=0)   # (t, C2)
            d2 = jnp.mean(yb[1:], axis=0) - jnp.mean(cy[:u - 1], axis=0)   # (t, C2)
            du = 0.5 * (d1 + d2)
            x2g = _sigmoid(jnp.dot(du, ws3_ref[...],
                                   preferred_element_type=jnp.float32))    # (t, C)

            # gate = x1 * x2 (broadcast over u)
            o_ref[...] = (x1 * x2g[None, :, :]).reshape(1, ut, C)

    return pl.pallas_call(
        kernel,
        out_shape=jax.ShapeDtypeStruct((b, ut, C), jnp.float32),
        grid=(b, nh),
        in_specs=[
            pl.BlockSpec((ut, th, WC), lambda i, h: (i, h, 0)),
            pl.BlockSpec((3, C, C), lambda i, h: (0, 0, 0)),
            pl.BlockSpec((1, C), lambda i, h: (0, 0)),
            pl.BlockSpec((1, C), lambda i, h: (0, 0)),
            pl.BlockSpec((C, C), lambda i, h: (0, 0)),
            pl.BlockSpec((C, C2), lambda i, h: (0, 0)),
            pl.BlockSpec((1, C2), lambda i, h: (0, 0)),
            pl.BlockSpec((1, C2), lambda i, h: (0, 0)),
            pl.BlockSpec((3, C2, C2), lambda i, h: (0, 0, 0)),
            pl.BlockSpec((C2, C), lambda i, h: (0, 0)),
        ],
        out_specs=pl.BlockSpec((1, ut, C), lambda i, h: (i, 0, 0)),
        scratch_shapes=[pltpu.VMEM((ut, WC), jnp.float32)],
        compiler_params=pltpu.CompilerParams(
            dimension_semantics=("parallel", "arbitrary"),
            vmem_limit_bytes=32 * 1024 * 1024),
    )(x_base, p['w3x1'], p['bn1_scale'], p['bn1_shift'], p['w1x1'],
      p['w_sma1'], p['sma_bn_scale'], p['sma_bn_shift'],
      p['w_sma2'], p['w_sma3'])


# ---------------------------------------------------------------------------
# Kernel B: (gate+1)*x, conv_u along H (block-diag taps, lane-dense), BN2, ReLU
# ---------------------------------------------------------------------------
def merge_conv(x3, gate, w_taps, scale_wc, shift_wc, *, tile_rows):
    """x3: (N, H, W*C); gate: (N, 1, C); w_taps: (3, WC, WC); scale/shift: (1, WC)."""
    N, H, WC = x3.shape
    C = gate.shape[-1]
    W = WC // C
    assert N % tile_rows == 0
    grid = N // tile_rows
    bn = tile_rows

    def kernel(x_ref, g_ref, w_ref, s_ref, b_ref, o_ref):
        # merge: (gate + 1) * x; gate broadcast over (H, W) in the WC lane layout
        g = g_ref[...].reshape(bn, C)
        gwc = jnp.tile(g, (1, W))                                  # (bn, WC)
        xm = x_ref[...] * (gwc[:, None, :] + 1.0)                  # (bn, H, WC)

        # conv_u along H: 3 lane-dense (rows, WC) x (WC, WC) matmuls with
        # block-diagonal per-tap weights, then H-shifted accumulation.
        xr = xm.reshape(bn * H, WC)
        z0 = jnp.dot(xr, w_ref[0],
                     preferred_element_type=jnp.float32).reshape(bn, H, WC)
        z1 = jnp.dot(xr, w_ref[1],
                     preferred_element_type=jnp.float32).reshape(bn, H, WC)
        z2 = jnp.dot(xr, w_ref[2],
                     preferred_element_type=jnp.float32).reshape(bn, H, WC)
        zrow = jnp.zeros((bn, 1, WC), jnp.float32)
        # out[h] = tap0 @ in[h-1] + tap1 @ in[h] + tap2 @ in[h+1]  (zero-padded)
        y = (z1
             + jnp.concatenate([zrow, z0[:, :H - 1, :]], axis=1)
             + jnp.concatenate([z2[:, 1:, :], zrow], axis=1))

        # BN2 (folded) + ReLU, lane-dense store
        y = y * s_ref[...].reshape(1, 1, WC) + b_ref[...].reshape(1, 1, WC)
        o_ref[...] = jnp.maximum(y, 0.0)

    return pl.pallas_call(
        kernel,
        out_shape=jax.ShapeDtypeStruct((N, H, WC), jnp.float32),
        grid=(grid,),
        in_specs=[
            pl.BlockSpec((bn, H, WC), lambda i: (i, 0, 0)),
            pl.BlockSpec((bn, 1, C), lambda i: (i, 0, 0)),
            pl.BlockSpec((3, WC, WC), lambda i: (0, 0, 0)),
            pl.BlockSpec((1, WC), lambda i: (0, 0)),
            pl.BlockSpec((1, WC), lambda i: (0, 0)),
        ],
        out_specs=pl.BlockSpec((bn, H, WC), lambda i: (i, 0, 0)),
        compiler_params=pltpu.CompilerParams(
            dimension_semantics=("parallel",),
            vmem_limit_bytes=32 * 1024 * 1024),
    )(x3, gate, w_taps, scale_wc, shift_wc)


# ---------------------------------------------------------------------------
# Full InterSIM forward
# ---------------------------------------------------------------------------
def inter_sim_forward(x_nchw, p, *, b, u, t):
    N, C, H, W = x_nchw.shape
    assert N == b * u * t
    WC = W * C

    # NCHW -> (N, H, W*C) lane-dense rows.  These transposes are pure layout
    # glue (a full HBM round-trip each); in a real network keep activations in
    # NHWC across layers to amortize them.
    x_base = jnp.transpose(x_nchw, (0, 2, 3, 1)).reshape(N, H, WC)

    # Kernel A: avg-pool (H-tiled) + full gate chain (x1 * x2) per clip b.
    gate3 = pool_gate(x_base, p, b=b, u=u, t=t)           # (b, u*t, C)
    gate = gate3.reshape(N, 1, C)                          # no W pre-tiling

    # Kernel B: merge + conv_u + bn2 + relu (lane-dense W*C layout).
    w_taps = _block_diag_taps(p['w_convu'], W)             # (3, WC, WC)
    scale_wc = jnp.tile(p['bn2_scale'], (1, W))            # (1, WC)
    shift_wc = jnp.tile(p['bn2_shift'], (1, W))
    tile_rows = _choose_row_tile(N, H, WC)
    out3 = merge_conv(x_base, gate, w_taps, scale_wc, shift_wc,
                      tile_rows=tile_rows)

    return jnp.transpose(out3.reshape(N, H, W, C), (0, 3, 1, 2))   # back to NCHW


# ---------------------------------------------------------------------------
# Deterministic synthetic parameters (BN folded to scale/shift, eval mode)
# ---------------------------------------------------------------------------
def init_params(key, ch_in):
    C = ch_in
    C2 = C // 2
    ks = list(jax.random.split(key, 12))

    def nrm(k, shape, s=0.1):
        return (s * jax.random.normal(k, shape)).astype(jnp.float32)

    def bn(k, c):
        k1, k2, k3, k4 = jax.random.split(k, 4)
        gamma = 1.0 + 0.1 * jax.random.normal(k1, (c,))
        beta = 0.1 * jax.random.normal(k2, (c,))
        mean = 0.1 * jax.random.normal(k3, (c,))
        var = jax.random.uniform(k4, (c,), minval=0.5, maxval=1.5)
        scale = (gamma * jax.lax.rsqrt(var + 1e-5)).astype(jnp.float32)
        shift = (beta - mean * scale).astype(jnp.float32)
        return scale.reshape(1, c), shift.reshape(1, c)

    p = {}
    p['w3x1'] = nrm(ks[0], (3, C, C))        # conv3x1: taps along u, (k, cin, cout)
    p['bn1_scale'], p['bn1_shift'] = bn(ks[1], C)
    p['w1x1'] = nrm(ks[2], (C, C))           # conv1x1
    p['w_sma1'] = nrm(ks[3], (C, C2))        # InterSMA.conv1 (1x1, C -> C/2)
    p['sma_bn_scale'], p['sma_bn_shift'] = bn(ks[4], C2)
    p['w_sma2'] = nrm(ks[5], (3, C2, C2))    # InterSMA.conv2: taps along t
    p['w_sma3'] = nrm(ks[6], (C2, C))        # InterSMA.conv3 (1x1, C/2 -> C)
    p['w_convu'] = nrm(ks[7], (3, C, C))     # conv_u: taps along H
    p['bn2_scale'], p['bn2_shift'] = bn(ks[8], C)
    return p


if __name__ == "__main__":
    b, u, t = 2, 2, 4
    ch_in = 16
    H = W = 8
    N = b * u * t                                   # 16

    key = jax.random.PRNGKey(0)
    kx, kp = jax.random.split(key)
    x = jax.random.normal(kx, (N, ch_in, H, W), dtype=jnp.float32)
    params = init_params(kp, ch_in)

    fwd = jax.jit(functools.partial(inter_sim_forward, b=b, u=u, t=t))
    out = fwd(x, params)
    jax.block_until_ready(out)
    assert out.shape == (N, ch_in, H, W), out.shape
    assert bool(jnp.all(jnp.isfinite(out)))
    print("KERNEL_OK")
</pallas_src>

<mosaic_0001>
module attributes {stable_mosaic.version = 11 : i64} {
  func.func @kernel(%arg0: i32, %arg1: i32, %arg2: memref<8x8x128xf32, #tpu.memory_space<vmem>>, %arg3: memref<3x16x16xf32, #tpu.memory_space<vmem>>, %arg4: memref<1x16xf32, #tpu.memory_space<vmem>>, %arg5: memref<1x16xf32, #tpu.memory_space<vmem>>, %arg6: memref<16x16xf32, #tpu.memory_space<vmem>>, %arg7: memref<16x8xf32, #tpu.memory_space<vmem>>, %arg8: memref<1x8xf32, #tpu.memory_space<vmem>>, %arg9: memref<1x8xf32, #tpu.memory_space<vmem>>, %arg10: memref<3x8x8xf32, #tpu.memory_space<vmem>>, %arg11: memref<8x16xf32, #tpu.memory_space<vmem>>, %arg12: memref<1x8x16xf32, #tpu.memory_space<vmem>>, %arg13: memref<8x128xf32, #tpu.memory_space<vmem>>) attributes {dimension_semantics = [#tpu.dimension_semantics<parallel>, #tpu.dimension_semantics<arbitrary>], iteration_bounds = array<i64: 2, 1>, scalar_prefetch = 0 : i64, scratch_operands = 1 : i64, tpu.core_type = #tpu.core_type<tc>, window_params = [{transform_indices = @transform_0, window_bounds = array<i64: 8, 8, 128>}, {pipeline_mode = #tpu.pipeline_mode<synchronous>, transform_indices = @transform_1, window_bounds = array<i64: 3, 16, 16>}, {pipeline_mode = #tpu.pipeline_mode<synchronous>, transform_indices = @transform_2, window_bounds = array<i64: 1, 16>}, {pipeline_mode = #tpu.pipeline_mode<synchronous>, transform_indices = @transform_3, window_bounds = array<i64: 1, 16>}, {pipeline_mode = #tpu.pipeline_mode<synchronous>, transform_indices = @transform_4, window_bounds = array<i64: 16, 16>}, {pipeline_mode = #tpu.pipeline_mode<synchronous>, transform_indices = @transform_5, window_bounds = array<i64: 16, 8>}, {pipeline_mode = #tpu.pipeline_mode<synchronous>, transform_indices = @transform_6, window_bounds = array<i64: 1, 8>}, {pipeline_mode = #tpu.pipeline_mode<synchronous>, transform_indices = @transform_7, window_bounds = array<i64: 1, 8>}, {pipeline_mode = #tpu.pipeline_mode<synchronous>, transform_indices = @transform_8, window_bounds = array<i64: 3, 8, 8>}, {pipeline_mode = #tpu.pipeline_mode<synchronous>, transform_indices = @transform_9, window_bounds = array<i64: 8, 16>}, {transform_indices = @transform_10, window_bounds = array<i64: 1, 8, 16>}]} {
    %c0_i32 = arith.constant 0 : i32
    %0 = arith.cmpi eq, %arg1, %c0_i32 : i32
    %1 = arith.extui %0 : i1 to i32
    %c0_i32_0 = arith.constant 0 : i32
    %2 = arith.cmpi ne, %1, %c0_i32_0 : i32
    scf.if %2 {
      %cst_9 = arith.constant 0.000000e+00 : f32
      %11 = vector.broadcast %cst_9 : f32 to vector<8x128xf32>
      %c0_10 = arith.constant 0 : index
      %c0_11 = arith.constant 0 : index
      %12 = vector.load %arg13[%c0_10, %c0_11] : memref<8x128xf32, #tpu.memory_space<vmem>>, vector<8x128xf32>
      tpu.vector_store %arg13[%c0_10, %c0_11], %11 {strides = array<i32>} : memref<8x128xf32, #tpu.memory_space<vmem>>, vector<8x128xf32>,
    } else {
    }
    %c0 = arith.constant 0 : index
    %c0_1 = arith.constant 0 : index
    %3 = vector.load %arg13[%c0, %c0_1] : memref<8x128xf32, #tpu.memory_space<vmem>>, vector<8x128xf32>
    %c0_2 = arith.constant 0 : index
    %c0_3 = arith.constant 0 : index
    %c0_4 = arith.constant 0 : index
    %4 = vector.load %arg2[%c0_2, %c0_3, %c0_4] : memref<8x8x128xf32, #tpu.memory_space<vmem>>, vector<8x8x128xf32>
    %cst = arith.constant dense<0.000000e+00> : vector<8x128xf32>
    %5 = vector.multi_reduction <add>, %4, %cst [1] : vector<8x8x128xf32> to vector<8x128xf32>
    %6 = arith.addf %3, %5 : vector<8x128xf32>
    %c0_5 = arith.constant 0 : index
    %c0_6 = arith.constant 0 : index
    %7 = vector.load %arg13[%c0_5, %c0_6] : memref<8x128xf32, #tpu.memory_space<vmem>>, vector<8x128xf32>
    tpu.vector_store %arg13[%c0_5, %c0_6], %6 {strides = array<i32>} : memref<8x128xf32, #tpu.memory_space<vmem>>, vector<8x128xf32>,
    %c0_i32_7 = arith.constant 0 : i32
    %8 = arith.cmpi eq, %arg1, %c0_i32_7 : i32
    %9 = arith.extui %8 : i1 to i32
    %c0_i32_8 = arith.constant 0 : i32
    %10 = arith.cmpi ne, %9, %c0_i32_8 : i32
    scf.if %10 {
      %c0_9 = arith.constant 0 : index
      %c0_10 = arith.constant 0 : index
      %11 = vector.load %arg13[%c0_9, %c0_10] : memref<8x128xf32, #tpu.memory_space<vmem>>, vector<8x128xf32>
      %12 = vector.shape_cast %11 : vector<8x128xf32> to vector<8x8x16xf32>
      %cst_11 = arith.constant dense<0.000000e+00> : vector<8x16xf32>
      %13 = vector.multi_reduction <add>, %12, %cst_11 [1] : vector<8x8x16xf32> to vector<8x16xf32>
      %cst_12 = arith.constant 1.562500e-02 : f32
      %14 = vector.broadcast %cst_12 : f32 to vector<8x16xf32>
      %15 = arith.mulf %13, %14 : vector<8x16xf32>
      %16 = vector.shape_cast %15 : vector<8x16xf32> to vector<2x4x16xf32>
      %cst_13 = arith.constant 0.000000e+00 : f32
      %17 = vector.broadcast %cst_13 : f32 to vector<1x4x16xf32>
      %18 = tpu.concatenate %17, %16, %17 in 0 : vector<1x4x16xf32>, vector<2x4x16xf32>, vector<1x4x16xf32> -> vector<4x4x16xf32>
      %cst_14 = arith.constant 0.000000e+00 : f32
      %19 = vector.broadcast %cst_14 : f32 to vector<8x16xf32>
      %20 = vector.extract_strided_slice %18 {offsets = [0, 0, 0], sizes = [2, 4, 16], strides = [1, 1, 1]} : vector<4x4x16xf32> to vector<2x4x16xf32>
      %21 = vector.shape_cast %20 : vector<2x4x16xf32> to vector<8x16xf32>
      %c0_15 = arith.constant 0 : index
      %c0_16 = arith.constant 0 : index
      %c0_17 = arith.constant 0 : index
      %22 = vector.load %arg3[%c0_15, %c0_16, %c0_17] : memref<3x16x16xf32, #tpu.memory_space<vmem>>, vector<1x16x16xf32>
      %23 = vector.shape_cast %22 : vector<1x16x16xf32> to vector<16x16xf32>
      %cst_18 = arith.constant dense<0.000000e+00> : vector<8x16xf32>
      %24 = tpu.matmul %21, %23, %cst_18 {dimension_numbers = #tpu.dot_dimension_numbers<[1], [0], [0], [1], [0, 0, 1, 1], [], []>} : vector<8x16xf32>, vector<16x16xf32>, vector<8x16xf32> -> vector<8x16xf32>
      %25 = arith.addf %19, %24 : vector<8x16xf32>
      %26 = vector.extract_strided_slice %18 {offsets = [1, 0, 0], sizes = [2, 4, 16], strides = [1, 1, 1]} : vector<4x4x16xf32> to vector<2x4x16xf32>
      %27 = vector.shape_cast %26 : vector<2x4x16xf32> to vector<8x16xf32>
      %c1 = arith.constant 1 : index
      %c0_19 = arith.constant 0 : index
      %c0_20 = arith.constant 0 : index
      %28 = vector.load %arg3[%c1, %c0_19, %c0_20] : memref<3x16x16xf32, #tpu.memory_space<vmem>>, vector<1x16x16xf32>
      %29 = vector.shape_cast %28 : vector<1x16x16xf32> to vector<16x16xf32>
      %cst_21 = arith.constant dense<0.000000e+00> : vector<8x16xf32>
      %30 = tpu.matmul %27, %29, %cst_21 {dimension_numbers = #tpu.dot_dimension_numbers<[1], [0], [0], [1], [0, 0, 1, 1], [], []>} : vector<8x16xf32>, vector<16x16xf32>, vector<8x16xf32> -> vector<8x16xf32>
      %31 = arith.addf %25, %30 : vector<8x16xf32>
      %32 = vector.extract_strided_slice %18 {offsets = [2, 0, 0], sizes = [2, 4, 16], strides = [1, 1, 1]} : vector<4x4x16xf32> to vector<2x4x16xf32>
      %33 = vector.shape_cast %32 : vector<2x4x16xf32> to vector<8x16xf32>
      %c2 = arith.constant 2 : index
      %c0_22 = arith.constant 0 : index
      %c0_23 = arith.constant 0 : index
      %34 = vector.load %arg3[%c2, %c0_22, %c0_23] : memref<3x16x16xf32, #tpu.memory_space<vmem>>, vector<1x16x16xf32>
      %35 = vector.shape_cast %34 : vector<1x16x16xf32> to vector<16x16xf32>
      %cst_24 = arith.constant dense<0.000000e+00> : vector<8x16xf32>
      %36 = tpu.matmul %33, %35, %cst_24 {dimension_numbers = #tpu.dot_dimension_numbers<[1], [0], [0], [1], [0, 0, 1, 1], [], []>} : vector<8x16xf32>, vector<16x16xf32>, vector<8x16xf32> -> vector<8x16xf32>
      %37 = arith.addf %31, %36 : vector<8x16xf32>
      %c0_25 = arith.constant 0 : index
      %c0_26 = arith.constant 0 : index
      %38 = vector.load %arg4[%c0_25, %c0_26] : memref<1x16xf32, #tpu.memory_space<vmem>>, vector<1x16xf32>
      %39 = vector.broadcast %38 : vector<1x16xf32> to vector<8x16xf32>
      %40 = arith.mulf %37, %39 : vector<8x16xf32>
      %c0_27 = arith.constant 0 : index
      %c0_28 = arith.constant 0 : index
      %41 = vector.load %arg5[%c0_27, %c0_28] : memref<1x16xf32, #tpu.memory_space<vmem>>, vector<1x16xf32>
      %42 = vector.broadcast %41 : vector<1x16xf32> to vector<8x16xf32>
      %43 = arith.addf %40, %42 : vector<8x16xf32>
      %c0_29 = arith.constant 0 : index
      %c0_30 = arith.constant 0 : index
      %44 = vector.load %arg6[%c0_29, %c0_30] : memref<16x16xf32, #tpu.memory_space<vmem>>, vector<16x16xf32>
      %cst_31 = arith.constant dense<0.000000e+00> : vector<8x16xf32>
      %45 = tpu.matmul %43, %44, %cst_31 {dimension_numbers = #tpu.dot_dimension_numbers<[1], [0], [0], [1], [0, 0, 1, 1], [], []>} : vector<8x16xf32>, vector<16x16xf32>, vector<8x16xf32> -> vector<8x16xf32>
      %cst_32 = arith.constant 0.000000e+00 : f32
      %46 = vector.broadcast %cst_32 : f32 to vector<8x16xf32>
      %47 = arith.subf %46, %45 : vector<8x16xf32>
      %48 = math.exp %47 : vector<8x16xf32>
      %cst_33 = arith.constant 1.000000e+00 : f32
      %49 = vector.broadcast %cst_33 : f32 to vector<8x16xf32>
      %50 = arith.addf %49, %48 : vector<8x16xf32>
      %cst_34 = arith.constant 1.000000e+00 : f32
      %51 = vector.broadcast %cst_34 : f32 to vector<8x16xf32>
      %52 = arith.divf %51, %50 : vector<8x16xf32>
      %53 = vector.shape_cast %52 : vector<8x16xf32> to vector<2x4x16xf32>
      %c0_35 = arith.constant 0 : index
      %c0_36 = arith.constant 0 : index
      %54 = vector.load %arg7[%c0_35, %c0_36] : memref<16x8xf32, #tpu.memory_space<vmem>>, vector<16x8xf32>
      %cst_37 = arith.constant dense<0.000000e+00> : vector<8x8xf32>
      %55 = tpu.matmul %15, %54, %cst_37 {dimension_numbers = #tpu.dot_dimension_numbers<[1], [0], [0], [1], [0, 0, 1, 1], [], []>} : vector<8x16xf32>, vector<16x8xf32>, vector<8x8xf32> -> vector<8x8xf32>
      %c0_38 = arith.constant 0 : index
      %c0_39 = arith.constant 0 : index
      %56 = vector.load %arg8[%c0_38, %c0_39] : memref<1x8xf32, #tpu.memory_space<vmem>>, vector<1x8xf32>
      %57 = vector.broadcast %56 : vector<1x8xf32> to vector<8x8xf32>
      %58 = arith.mulf %55, %57 : vector<8x8xf32>
      %c0_40 = arith.constant 0 : index
      %c0_41 = arith.constant 0 : index
      %59 = vector.load %arg9[%c0_40, %c0_41] : memref<1x8xf32, #tpu.memory_space<vmem>>, vector<1x8xf32>
      %60 = vector.broadcast %59 : vector<1x8xf32> to vector<8x8xf32>
      %61 = arith.addf %58, %60 : vector<8x8xf32>
      %cst_42 = arith.constant 0.000000e+00 : f32
      %62 = vector.broadcast %cst_42 : f32 to vector<8x8xf32>
      %63 = arith.maximumf %61, %62 : vector<8x8xf32>
      %64 = vector.shape_cast %63 : vector<8x8xf32> to vector<2x4x8xf32>
      %cst_43 = arith.constant 0.000000e+00 : f32
      %65 = vector.broadcast %cst_43 : f32 to vector<2x1x8xf32>
      %66 = tpu.concatenate %65, %64, %65 in 1 : vector<2x1x8xf32>, vector<2x4x8xf32>, vector<2x1x8xf32> -> vector<2x6x8xf32>
      %cst_44 = arith.constant 0.000000e+00 : f32
      %67 = vector.broadcast %cst_44 : f32 to vector<8x8xf32>
      %68 = vector.extract_strided_slice %66 {offsets = [0, 0, 0], sizes = [2, 4, 8], strides = [1, 1, 1]} : vector<2x6x8xf32> to vector<2x4x8xf32>
      %69 = vector.shape_cast %68 : vector<2x4x8xf32> to vector<8x8xf32>
      %c0_45 = arith.constant 0 : index
      %c0_46 = arith.constant 0 : index
      %c0_47 = arith.constant 0 : index
      %70 = vector.load %arg10[%c0_45, %c0_46, %c0_47] : memref<3x8x8xf32, #tpu.memory_space<vmem>>, vector<1x8x8xf32>
      %71 = vector.shape_cast %70 : vector<1x8x8xf32> to vector<8x8xf32>
      %cst_48 = arith.constant dense<0.000000e+00> : vector<8x8xf32>
      %72 = tpu.matmul %69, %71, %cst_48 {dimension_numbers = #tpu.dot_dimension_numbers<[1], [0], [0], [1], [0, 0, 1, 1], [], []>} : vector<8x8xf32>, vector<8x8xf32>, vector<8x8xf32> -> vector<8x8xf32>
      %73 = arith.addf %67, %72 : vector<8x8xf32>
      %74 = vector.extract_strided_slice %66 {offsets = [0, 1, 0], sizes = [2, 4, 8], strides = [1, 1, 1]} : vector<2x6x8xf32> to vector<2x4x8xf32>
      %75 = vector.shape_cast %74 : vector<2x4x8xf32> to vector<8x8xf32>
      %c1_49 = arith.constant 1 : index
      %c0_50 = arith.constant 0 : index
      %c0_51 = arith.constant 0 : index
      %76 = vector.load %arg10[%c1_49, %c0_50, %c0_51] : memref<3x8x8xf32, #tpu.memory_space<vmem>>, vector<1x8x8xf32>
      %77 = vector.shape_cast %76 : vector<1x8x8xf32> to vector<8x8xf32>
      %cst_52 = arith.constant dense<0.000000e+00> : vector<8x8xf32>
      %78 = tpu.matmul %75, %77, %cst_52 {dimension_numbers = #tpu.dot_dimension_numbers<[1], [0], [0], [1], [0, 0, 1, 1], [], []>} : vector<8x8xf32>, vector<8x8xf32>, vector<8x8xf32> -> vector<8x8xf32>
      %79 = arith.addf %73, %78 : vector<8x8xf32>
      %80 = vector.extract_strided_slice %66 {offsets = [0, 2, 0], sizes = [2, 4, 8], strides = [1, 1, 1]} : vector<2x6x8xf32> to vector<2x4x8xf32>
      %81 = vector.shape_cast %80 : vector<2x4x8xf32> to vector<8x8xf32>
      %c2_53 = arith.constant 2 : index
      %c0_54 = arith.constant 0 : index
      %c0_55 = arith.constant 0 : index
      %82 = vector.load %arg10[%c2_53, %c0_54, %c0_55] : memref<3x8x8xf32, #tpu.memory_space<vmem>>, vector<1x8x8xf32>
      %83 = vector.shape_cast %82 : vector<1x8x8xf32> to vector<8x8xf32>
      %cst_56 = arith.constant dense<0.000000e+00> : vector<8x8xf32>
      %84 = tpu.matmul %81, %83, %cst_56 {dimension_numbers = #tpu.dot_dimension_numbers<[1], [0], [0], [1], [0, 0, 1, 1], [], []>} : vector<8x8xf32>, vector<8x8xf32>, vector<8x8xf32> -> vector<8x8xf32>
      %85 = arith.addf %79, %84 : vector<8x8xf32>
      %86 = vector.shape_cast %85 : vector<8x8xf32> to vector<2x4x8xf32>
      %87 = vector.extract_strided_slice %64 {offsets = [0, 0, 0], sizes = [1, 4, 8], strides = [1, 1, 1]} : vector<2x4x8xf32> to vector<1x4x8xf32>
      %cst_57 = arith.constant dense<0.000000e+00> : vector<4x8xf32>
      %88 = vector.multi_reduction <add>, %87, %cst_57 [0] : vector<1x4x8xf32> to vector<4x8xf32>
      %cst_58 = arith.constant 1.000000e+00 : f32
      %89 = vector.broadcast %cst_58 : f32 to vector<4x8xf32>
      %90 = arith.divf %88, %89 : vector<4x8xf32>
      %91 = vector.extract_strided_slice %86 {offsets = [1, 0, 0], sizes = [1, 4, 8], strides = [1, 1, 1]} : vector<2x4x8xf32> to vector<1x4x8xf32>
      %cst_59 = arith.constant dense<0.000000e+00> : vector<4x8xf32>
      %92 = vector.multi_reduction <add>, %91, %cst_59 [0] : vector<1x4x8xf32> to vector<4x8xf32>
      %cst_60 = arith.constant 1.000000e+00 : f32
      %93 = vector.broadcast %cst_60 : f32 to vector<4x8xf32>
      %94 = arith.divf %92, %93 : vector<4x8xf32>
      %95 = arith.subf %90, %94 : vector<4x8xf32>
      %96 = vector.extract_strided_slice %64 {offsets = [1, 0, 0], sizes = [1, 4, 8], strides = [1, 1, 1]} : vector<2x4x8xf32> to vector<1x4x8xf32>
      %cst_61 = arith.constant dense<0.000000e+00> : vector<4x8xf32>
      %97 = vector.multi_reduction <add>, %96, %cst_61 [0] : vector<1x4x8xf32> to vector<4x8xf32>
      %cst_62 = arith.constant 1.000000e+00 : f32
      %98 = vector.broadcast %cst_62 : f32 to vector<4x8xf32>
      %99 = arith.divf %97, %98 : vector<4x8xf32>
      %100 = vector.extract_strided_slice %86 {offsets = [0, 0, 0], sizes = [1, 4, 8], strides = [1, 1, 1]} : vector<2x4x8xf32> to vector<1x4x8xf32>
      %cst_63 = arith.constant dense<0.000000e+00> : vector<4x8xf32>
      %101 = vector.multi_reduction <add>, %100, %cst_63 [0] : vector<1x4x8xf32> to vector<4x8xf32>
      %cst_64 = arith.constant 1.000000e+00 : f32
      %102 = vector.broadcast %cst_64 : f32 to vector<4x8xf32>
      %103 = arith.divf %101, %102 : vector<4x8xf32>
      %104 = arith.subf %99, %103 : vector<4x8xf32>
      %105 = arith.addf %95, %104 : vector<4x8xf32>
      %cst_65 = arith.constant 5.000000e-01 : f32
      %106 = vector.broadcast %cst_65 : f32 to vector<4x8xf32>
      %107 = arith.mulf %106, %105 : vector<4x8xf32>
      %c0_66 = arith.constant 0 : index
      %c0_67 = arith.constant 0 : index
      %108 = vector.load %arg11[%c0_66, %c0_67] : memref<8x16xf32, #tpu.memory_space<vmem>>, vector<8x16xf32>
      %cst_68 = arith.constant dense<0.000000e+00> : vector<4x16xf32>
      %109 = tpu.matmul %107, %108, %cst_68 {dimension_numbers = #tpu.dot_dimension_numbers<[1], [0], [0], [1], [0, 0, 1, 1], [], []>} : vector<4x8xf32>, vector<8x16xf32>, vector<4x16xf32> -> vector<4x16xf32>
      %cst_69 = arith.constant 0.000000e+00 : f32
      %110 = vector.broadcast %cst_69 : f32 to vector<4x16xf32>
      %111 = arith.subf %110, %109 : vector<4x16xf32>
      %112 = math.exp %111 : vector<4x16xf32>
      %cst_70 = arith.constant 1.000000e+00 : f32
      %113 = vector.broadcast %cst_70 : f32 to vector<4x16xf32>
      %114 = arith.addf %113, %112 : vector<4x16xf32>
      %cst_71 = arith.constant 1.000000e+00 : f32
      %115 = vector.broadcast %cst_71 : f32 to vector<4x16xf32>
      %116 = arith.divf %115, %114 : vector<4x16xf32>
      %117 = vector.shape_cast %116 : vector<4x16xf32> to vector<1x4x16xf32>
      %118 = vector.broadcast %117 : vector<1x4x16xf32> to vector<2x4x16xf32>
      %119 = arith.mulf %53, %118 : vector<2x4x16xf32>
      %120 = vector.shape_cast %119 : vector<2x4x16xf32> to vector<1x8x16xf32>
      %c0_72 = arith.constant 0 : index
      %c0_73 = arith.constant 0 : index
      %c0_74 = arith.constant 0 : index
      %121 = vector.load %arg12[%c0_72, %c0_73, %c0_74] : memref<1x8x16xf32, #tpu.memory_space<vmem>>, vector<1x8x16xf32>
      tpu.vector_store %arg12[%c0_72, %c0_73, %c0_74], %120 {strides = array<i32>} : memref<1x8x16xf32, #tpu.memory_space<vmem>>, vector<1x8x16xf32>,
    } else {
    }
    return
  }
  func.func @transform_0(%arg0: i32, %arg1: i32) -> (i32, i32, i32) {
    %c0_i32 = arith.constant 0 : i32
    %c0_i32_0 = arith.constant 0 : i32
    return %arg0, %arg1, %c0_i32 : i32, i32, i32
  }
  func.func @transform_1(%arg0: i32, %arg1: i32) -> (i32, i32, i32) {
    %c0_i32 = arith.constant 0 : i32
    %c0_i32_0 = arith.constant 0 : i32
    %c0_i32_1 = arith.constant 0 : i32
    %c0_i32_2 = arith.constant 0 : i32
    return %c0_i32, %c0_i32_0, %c0_i32_1 : i32, i32, i32
  }
  func.func @transform_2(%arg0: i32, %arg1: i32) -> (i32, i32) {
    %c0_i32 = arith.constant 0 : i32
    %c0_i32_0 = arith.constant 0 : i32
    %c0_i32_1 = arith.constant 0 : i32
    return %c0_i32, %c0_i32_0 : i32, i32
  }
  func.func @transform_3(%arg0: i32, %arg1: i32) -> (i32, i32) {
    %c0_i32 = arith.constant 0 : i32
    %c0_i32_0 = arith.constant 0 : i32
    %c0_i32_1 = arith.constant 0 : i32
    return %c0_i32, %c0_i32_0 : i32, i32
  }
  func.func @transform_4(%arg0: i32, %arg1: i32) -> (i32, i32) {
    %c0_i32 = arith.constant 0 : i32
    %c0_i32_0 = arith.constant 0 : i32
    %c0_i32_1 = arith.constant 0 : i32
    return %c0_i32, %c0_i32_0 : i32, i32
  }
  func.func @transform_5(%arg0: i32, %arg1: i32) -> (i32, i32) {
    %c0_i32 = arith.constant 0 : i32
    %c0_i32_0 = arith.constant 0 : i32
    %c0_i32_1 = arith.constant 0 : i32
    return %c0_i32, %c0_i32_0 : i32, i32
  }
  func.func @transform_6(%arg0: i32, %arg1: i32) -> (i32, i32) {
    %c0_i32 = arith.constant 0 : i32
    %c0_i32_0 = arith.constant 0 : i32
    %c0_i32_1 = arith.constant 0 : i32
    return %c0_i32, %c0_i32_0 : i32, i32
  }
  func.func @transform_7(%arg0: i32, %arg1: i32) -> (i32, i32) {
    %c0_i32 = arith.constant 0 : i32
    %c0_i32_0 = arith.constant 0 : i32
    %c0_i32_1 = arith.constant 0 : i32
    return %c0_i32, %c0_i32_0 : i32, i32
  }
  func.func @transform_8(%arg0: i32, %arg1: i32) -> (i32, i32, i32) {
    %c0_i32 = arith.constant 0 : i32
    %c0_i32_0 = arith.constant 0 : i32
    %c0_i32_1 = arith.constant 0 : i32
    %c0_i32_2 = arith.constant 0 : i32
    return %c0_i32, %c0_i32_0, %c0_i32_1 : i32, i32, i32
  }
  func.func @transform_9(%arg0: i32, %arg1: i32) -> (i32, i32) {
    %c0_i32 = arith.constant 0 : i32
    %c0_i32_0 = arith.constant 0 : i32
    %c0_i32_1 = arith.constant 0 : i32
    return %c0_i32, %c0_i32_0 : i32, i32
  }
  func.func @transform_10(%arg0: i32, %arg1: i32) -> (i32, i32, i32) {
    %c0_i32 = arith.constant 0 : i32
    %c0_i32_0 = arith.constant 0 : i32
    %c0_i32_1 = arith.constant 0 : i32
    return %arg0, %c0_i32, %c0_i32_0 : i32, i32, i32
  }
}

module attributes {stable_mosaic.version = 11 : i64} {
  func.func @kernel(%arg0: i32, %arg1: memref<2x8x128xf32, #tpu.memory_space<vmem>>, %arg2: memref<2x1x16xf32, #tpu.memory_space<vmem>>, %arg3: memref<3x128x128xf32, #tpu.memory_space<vmem>>, %arg4: memref<1x128xf32, #tpu.memory_space<vmem>>, %arg5: memref<1x128xf32, #tpu.memory_space<vmem>>, %arg6: memref<2x8x128xf32, #tpu.memory_space<vmem>>) attributes {dimension_semantics = [#tpu.dimension_semantics<parallel>], iteration_bounds = array<i64: 8>, scalar_prefetch = 0 : i64, scratch_operands = 0 : i64, tpu.core_type = #tpu.core_type<tc>, window_params = [{transform_indices = @transform_0, window_bounds = array<i64: 2, 8, 128>}, {transform_indices = @transform_1, window_bounds = array<i64: 2, 1, 16>}, {pipeline_mode = #tpu.pipeline_mode<synchronous>, transform_indices = @transform_2, window_bounds = array<i64: 3, 128, 128>}, {pipeline_mode = #tpu.pipeline_mode<synchronous>, transform_indices = @transform_3, window_bounds = array<i64: 1, 128>}, {pipeline_mode = #tpu.pipeline_mode<synchronous>, transform_indices = @transform_4, window_bounds = array<i64: 1, 128>}, {transform_indices = @transform_5, window_bounds = array<i64: 2, 8, 128>}]} {
    %c0 = arith.constant 0 : index
    %c0_0 = arith.constant 0 : index
    %c0_1 = arith.constant 0 : index
    %0 = vector.load %arg2[%c0, %c0_0, %c0_1] : memref<2x1x16xf32, #tpu.memory_space<vmem>>, vector<2x1x16xf32>
    %1 = vector.shape_cast %0 : vector<2x1x16xf32> to vector<2x16xf32>
    %2 = tpu.concatenate %1, %1, %1, %1, %1, %1, %1, %1 in 1 : vector<2x16xf32>, vector<2x16xf32>, vector<2x16xf32>, vector<2x16xf32>, vector<2x16xf32>, vector<2x16xf32>, vector<2x16xf32>, vector<2x16xf32> -> vector<2x128xf32>
    %c0_2 = arith.constant 0 : index
    %c0_3 = arith.constant 0 : index
    %c0_4 = arith.constant 0 : index
    %3 = vector.load %arg1[%c0_2, %c0_3, %c0_4] : memref<2x8x128xf32, #tpu.memory_space<vmem>>, vector<2x8x128xf32>
    %4 = vector.shape_cast %2 : vector<2x128xf32> to vector<2x1x128xf32>
    %cst = arith.constant 1.000000e+00 : f32
    %5 = vector.broadcast %cst : f32 to vector<2x1x128xf32>
    %6 = arith.addf %4, %5 : vector<2x1x128xf32>
    %7 = vector.broadcast %6 : vector<2x1x128xf32> to vector<2x8x128xf32>
    %8 = arith.mulf %3, %7 : vector<2x8x128xf32>
    %9 = vector.shape_cast %8 : vector<2x8x128xf32> to vector<16x128xf32>
    %c0_5 = arith.constant 0 : index
    %c0_6 = arith.constant 0 : index
    %c0_7 = arith.constant 0 : index
    %10 = vector.load %arg3[%c0_5, %c0_6, %c0_7] : memref<3x128x128xf32, #tpu.memory_space<vmem>>, vector<1x128x128xf32>
    %11 = vector.shape_cast %10 : vector<1x128x128xf32> to vector<128x128xf32>
    %cst_8 = arith.constant dense<0.000000e+00> : vector<16x128xf32>
    %12 = tpu.matmul %9, %11, %cst_8 {dimension_numbers = #tpu.dot_dimension_numbers<[1], [0], [0], [1], [0, 0, 1, 1], [], []>} : vector<16x128xf32>, vector<128x128xf32>, vector<16x128xf32> -> vector<16x128xf32>
    %13 = vector.shape_cast %12 : vector<16x128xf32> to vector<2x8x128xf32>
    %c1 = arith.constant 1 : index
    %c0_9 = arith.constant 0 : index
    %c0_10 = arith.constant 0 : index
    %14 = vector.load %arg3[%c1, %c0_9, %c0_10] : memref<3x128x128xf32, #tpu.memory_space<vmem>>, vector<1x128x128xf32>
    %15 = vector.shape_cast %14 : vector<1x128x128xf32> to vector<128x128xf32>
    %cst_11 = arith.constant dense<0.000000e+00> : vector<16x128xf32>
    %16 = tpu.matmul %9, %15, %cst_11 {dimension_numbers = #tpu.dot_dimension_numbers<[1], [0], [0], [1], [0, 0, 1, 1], [], []>} : vector<16x128xf32>, vector<128x128xf32>, vector<16x128xf32> -> vector<16x128xf32>
    %17 = vector.shape_cast %16 : vector<16x128xf32> to vector<2x8x128xf32>
    %c2 = arith.constant 2 : index
    %c0_12 = arith.constant 0 : index
    %c0_13 = arith.constant 0 : index
    %18 = vector.load %arg3[%c2, %c0_12, %c0_13] : memref<3x128x128xf32, #tpu.memory_space<vmem>>, vector<1x128x128xf32>
    %19 = vector.shape_cast %18 : vector<1x128x128xf32> to vector<128x128xf32>
    %cst_14 = arith.constant dense<0.000000e+00> : vector<16x128xf32>
    %20 = tpu.matmul %9, %19, %cst_14 {dimension_numbers = #tpu.dot_dimension_numbers<[1], [0], [0], [1], [0, 0, 1, 1], [], []>} : vector<16x128xf32>, vector<128x128xf32>, vector<16x128xf32> -> vector<16x128xf32>
    %21 = vector.shape_cast %20 : vector<16x128xf32> to vector<2x8x128xf32>
    %cst_15 = arith.constant 0.000000e+00 : f32
    %22 = vector.broadcast %cst_15 : f32 to vector<2x1x128xf32>
    %23 = vector.extract_strided_slice %13 {offsets = [0, 0, 0], sizes = [2, 7, 128], strides = [1, 1, 1]} : vector<2x8x128xf32> to vector<2x7x128xf32>
    %24 = tpu.concatenate %22, %23 in 1 : vector<2x1x128xf32>, vector<2x7x128xf32> -> vector<2x8x128xf32>
    %25 = arith.addf %17, %24 : vector<2x8x128xf32>
    %26 = vector.extract_strided_slice %21 {offsets = [0, 1, 0], sizes = [2, 7, 128], strides = [1, 1, 1]} : vector<2x8x128xf32> to vector<2x7x128xf32>
    %27 = tpu.concatenate %26, %22 in 1 : vector<2x7x128xf32>, vector<2x1x128xf32> -> vector<2x8x128xf32>
    %28 = arith.addf %25, %27 : vector<2x8x128xf32>
    %c0_16 = arith.constant 0 : index
    %c0_17 = arith.constant 0 : index
    %29 = vector.load %arg4[%c0_16, %c0_17] : memref<1x128xf32, #tpu.memory_space<vmem>>, vector<1x128xf32>
    %30 = vector.shape_cast %29 : vector<1x128xf32> to vector<1x1x128xf32>
    %31 = vector.broadcast %30 : vector<1x1x128xf32> to vector<2x8x128xf32>
    %32 = arith.mulf %28, %31 : vector<2x8x128xf32>
    %c0_18 = arith.constant 0 : index
    %c0_19 = arith.constant 0 : index
    %33 = vector.load %arg5[%c0_18, %c0_19] : memref<1x128xf32, #tpu.memory_space<vmem>>, vector<1x128xf32>
    %34 = vector.shape_cast %33 : vector<1x128xf32> to vector<1x1x128xf32>
    %35 = vector.broadcast %34 : vector<1x1x128xf32> to vector<2x8x128xf32>
    %36 = arith.addf %32, %35 : vector<2x8x128xf32>
    %cst_20 = arith.constant 0.000000e+00 : f32
    %37 = vector.broadcast %cst_20 : f32 to vector<2x8x128xf32>
    %38 = arith.maximumf %36, %37 : vector<2x8x128xf32>
    %c0_21 = arith.constant 0 : index
    %c0_22 = arith.constant 0 : index
    %c0_23 = arith.constant 0 : index
    %39 = vector.load %arg6[%c0_21, %c0_22, %c0_23] : memref<2x8x128xf32, #tpu.memory_space<vmem>>, vector<2x8x128xf32>
    tpu.vector_store %arg6[%c0_21, %c0_22, %c0_23], %38 {strides = array<i32>} : memref<2x8x128xf32, #tpu.memory_space<vmem>>, vector<2x8x128xf32>,
    return
  }
  func.func @transform_0(%arg0: i32) -> (i32, i32, i32) {
    %c0_i32 = arith.constant 0 : i32
    %c0_i32_0 = arith.constant 0 : i32
    %c0_i32_1 = arith.constant 0 : i32
    return %arg0, %c0_i32, %c0_i32_0 : i32, i32, i32
  }
  func.func @transform_1(%arg0: i32) -> (i32, i32, i32) {
    %c0_i32 = arith.constant 0 : i32
    %c0_i32_0 = arith.constant 0 : i32
    %c0_i32_1 = arith.constant 0 : i32
    return %arg0, %c0_i32, %c0_i32_0 : i32, i32, i32
  }
  func.func @transform_2(%arg0: i32) -> (i32, i32, i32) {
    %c0_i32 = arith.constant 0 : i32
    %c0_i32_0 = arith.constant 0 : i32
    %c0_i32_1 = arith.constant 0 : i32
    %c0_i32_2 = arith.constant 0 : i32
    return %c0_i32, %c0_i32_0, %c0_i32_1 : i32, i32, i32
  }
  func.func @transform_3(%arg0: i32) -> (i32, i32) {
    %c0_i32 = arith.constant 0 : i32
    %c0_i32_0 = arith.constant 0 : i32
    %c0_i32_1 = arith.constant 0 : i32
    return %c0_i32, %c0_i32_0 : i32, i32
  }
  func.func @transform_4(%arg0: i32) -> (i32, i32) {
    %c0_i32 = arith.constant 0 : i32
    %c0_i32_0 = arith.constant 0 : i32
    %c0_i32_1 = arith.constant 0 : i32
    return %c0_i32, %c0_i32_0 : i32, i32
  }
  func.func @transform_5(%arg0: i32) -> (i32, i32, i32) {
    %c0_i32 = arith.constant 0 : i32
    %c0_i32_0 = arith.constant 0 : i32
    %c0_i32_1 = arith.constant 0 : i32
    return %arg0, %c0_i32, %c0_i32_0 : i32, i32, i32
  }
}

</mosaic_0001>

<bundles_post_ra>
// kernel: inter_sim_forward.2
= control target key start
LH: loop header
LB: loop body
LE: loop exit
PB: predicated region body
PF: predicated region fallthrough
CT: control target
= control target key end

     0   :  { %s2689_s0 = inlined_call_operand.vmem [shape: f32[16,8,128], index: 0, kind: input, shape index: {}]   ;;  %s2690_s1 = inlined_call_operand.hbm [shape: f32[3,16,16], index: 1, kind: input, shape index: {}]   ;;  %s2691_s2 = inlined_call_operand.hbm [shape: f32[1,16], index: 2, kind: input, shape index: {}]   ;;  %s2692_s3 = inlined_call_operand.hbm [shape: f32[1,16], index: 3, kind: input, shape index: {}]   ;;  %s2693_s4 = inlined_call_operand.hbm [shape: f32[16,16], index: 4, kind: input, shape index: {}]   ;;  %s2694_s5 = inlined_call_operand.vmem [shape: f32[16,8], index: 5, kind: input, shape index: {}]   ;;  %s2695_s6 = inlined_call_operand.hbm [shape: f32[1,8], index: 6, kind: input, shape index: {}]   ;;  %s2696_s7 = inlined_call_operand.hbm [shape: f32[1,8], index: 7, kind: input, shape index: {}]   ;;  %s2697_s8 = inlined_call_operand.hbm [shape: f32[3,8,8], index: 8, kind: input, shape index: {}]   ;;  %s2698_s9 = inlined_call_operand.hbm [shape: f32[8,16], index: 9, kind: input, shape index: {}]   ;;  %s2699_s10 = inlined_call_operand.vmem [shape: f32[2,8,16], index: 10, kind: output, shape index: {}]  }
   0x1   :  { %2703 = sst [smem:[#allocation21_spill]] %s2691_s2 }
   0x2   :  { %2704 = sst [smem:[#allocation22_spill]] %s2693_s4 }
   0x3   :  { %2705 = sst [smem:[#allocation23_spill]] %s2696_s7 }
   0x4   :  { %15 = vsyncpa [#allocation4], 0 }
   0x5   :  { %16 = vsyncpa [#allocation6], 0 }
   0x6   :  { %17 = vsyncpa [#allocation9], 0 }
   0x7   :  { %18 = vsyncpa [#allocation12], 0 }
   0x8   :  { %19 = vsyncpa [#allocation15], 0  ;;  %s2365_s13 = smov 0   ;;  %s2367_s14 = smov 0  }
   0x9   :  { %s2369_s15 = smov 0  }
   0xa LB: > { %s2288_s16 = smov [#allocation5]   ;;  %s1749_s18 = sadd.s32 4294967295, %s2286_s15   ;;  %s2286_s15 = sphi %s2369_s15, %s25_s15   ;;  %s2282_s14 = sphi %s2367_s14, %s2716_s14   ;;  %s2278_s13 = sphi %s2365_s13, %s2715_s13  }
   0xb   : > { %s311_s17 = sshll.u32 %s2288_s16, 4  ;;  %p1751_p0 = scmp.ge.s32.totalorder %s2286_s15, 1  ;;  %s312_s17 = int_to_ptr.vmem [resolvable:$true] %s311_s17 }
   0xc   : > { %p285_p1 = scmp.lt.s32.totalorder %s2286_s15, 3  ;;  %p2383_p2 = scmp.eq.s32.totalorder %s1749_s18, 0 }
   0xd   : > { %s2289_s21 = smov [#allocation8]   ;;  %s2290_s24 = smov [#allocation11]  }
   0xe   : > { %s2706_s19 = scalar_select %p2383_p2, 1, 0 }
   0xf   : > { %p2387_p3 = pnand %p1751_p0, %p285_p1  ;;  %s332_s22 = sshll.u32 %s2289_s21, 4  ;;  %s2393_s22 = int_to_ptr.vmem [resolvable:$true] %s332_s22 }
  0x10   : > { %s360_s25 = sshll.u32 %s2290_s24, 4  ;;  %s2709_s2 = sld [smem:[#allocation21_spill]]  ;;  %s2401_s25 = int_to_ptr.vmem [resolvable:$true] %s360_s25 }
  0x11   : > { %s2707_s20 = scalar_select %p2387_p3, 1, 0 }
  0x12   : > { %p1925_p4 = pneg %p2387_p3 }
  0x14   : > { %p2397_p5 = pnand %p2383_p2, %p1925_p4 }
  0x16   : > { %s2020_s28 = scalar_lea.hbm %s2709_s2, 16  ;;  %p2411_p7 = pneg %p2397_p5 }
  0x17   : > { %p2021_p6 = scmp.ne.s32.totalorder %s2709_s2, %s2020_s28  ;;  %p2027_p10 = scmp.lt.u32.totalorder %s2020_s28, %s2709_s2 }
  0x19   : > { %p2023_p8 = pnand %p2411_p7, %p2021_p6 }
  0x1b   : > { %p2024_p9 = pneg %p2023_p8 }
  0x1d   : > { %p2029_p11 = pnand %p2027_p10, %p2024_p9 }
  0x1f   : > { %2032 = shalt.err (!%p2029_p11)
}
  0x20   : > { %s2033_s18 = scalar_lea.vmem %s312_s17, 16  ;;  %s2040_s21 = scalar_lea.vmem %s312_s17, 32 }
  0x21   : > { %p2034_p12 = scmp.ne.s32.totalorder %s312_s17, %s2033_s18  ;;  %p2041_p1 = scmp.lt.s32.totalorder %s312_s17, %s312_s17 }
  0x22   : > { %p2042_p4 = scmp.lt.s32.totalorder %s2040_s21, %s2033_s18 }
  0x23   : > { %p2036_p13 = pnand %p2034_p12, %p2411_p7 }
  0x24   : > { %p2043_p2 = por %p2042_p4, %p2041_p1 }
  0x25   : > { %p2037_p0 = pneg %p2036_p13 }
  0x27   : > { %p2044_p3 = pnand %p2043_p2, %p2037_p0 }
  0x29   : > { %2047 = shalt.err (!%p2044_p3)
}
  0x2a   : > { %1931 = dma.hbm_to_vmem [thread:$0]  (!%p2397_p5), %s2709_s2, 16, %s312_s17, [#allocation6]  }
  0x2b   : > { %s2711_s4 = sld [smem:[#allocation22_spill]] }
  0x31   : > { %s2048_s29 = scalar_lea.hbm %s2711_s4, 256 }
  0x32   : > { %p2049_p6 = scmp.ne.s32.totalorder %s2711_s4, %s2048_s29  ;;  %p2055_p2 = scmp.lt.u32.totalorder %s2048_s29, %s2711_s4 }
  0x34   : > { %p2051_p8 = pnand %p2049_p6, %p2411_p7 }
  0x36   : > { %p2052_p9 = pneg %p2051_p8 }
  0x38   : > { %p2057_p3 = pnand %p2055_p2, %p2052_p9 }
  0x3a   : > { %2060 = shalt.err (!%p2057_p3)
}
  0x3b   : > { %s2061_s17 = scalar_lea.vmem %s2393_s22, 256  ;;  %p2069_p13 = scmp.lt.s32.totalorder %s2393_s22, %s2393_s22 }
  0x3c   : > { %p2062_p10 = scmp.ne.s32.totalorder %s2393_s22, %s2061_s17  ;;  %p2070_p0 = scmp.lt.s32.totalorder %s2061_s17, %s2061_s17 }
  0x3e   : > { %p2064_p11 = pnand %p2062_p10, %p2411_p7  ;;  %p2071_p1 = por %p2070_p0, %p2069_p13 }
  0x40   : > { %p2065_p12 = pneg %p2064_p11 }
  0x42   : > { %p2072_p4 = pnand %p2071_p1, %p2065_p12 }
  0x44   : > { %2075 = shalt.err (!%p2072_p4)
}
  0x45   : > { %s2291_s21 = smov 128   ;;  %s2292_s24 = smov 8  }
  0x46   : > { %1937 = dma.hbm_to_vmem [thread:$0]  (!%p2397_p5), %s2711_s4, 256, %s2393_s22, [#allocation9], %s2291_s21, %s2291_s21, %s2292_s24  }
  0x47   : > { %s2712_s7 = sld [smem:[#allocation23_spill]] }
  0x4d   : > { %s2076_s30 = scalar_lea.hbm %s2712_s7, 16 }
  0x4e   : > { %p2077_p6 = scmp.ne.s32.totalorder %s2712_s7, %s2076_s30  ;;  %p2083_p2 = scmp.lt.u32.totalorder %s2076_s30, %s2712_s7 }
  0x50   : > { %p2079_p8 = pnand %p2077_p6, %p2411_p7 }
  0x52   : > { %p2080_p9 = pneg %p2079_p8 }
  0x54   : > { %p2085_p3 = pnand %p2083_p2, %p2080_p9 }
  0x56   : > { %2088 = shalt.err (!%p2085_p3)
}
  0x57   : > { %s2089_s22 = scalar_lea.vmem %s2401_s25, 16  ;;  %s2096_s26 = scalar_lea.vmem %s2401_s25, 32 }
  0x58   : > { %p2090_p10 = scmp.ne.s32.totalorder %s2401_s25, %s2089_s22  ;;  %p2097_p13 = scmp.lt.s32.totalorder %s2401_s25, %s2401_s25 }
  0x59   : > { %p2098_p0 = scmp.lt.s32.totalorder %s2096_s26, %s2089_s22 }
  0x5a   : > { %p2092_p11 = pnand %p2090_p10, %p2411_p7 }
  0x5b   : > { %p2099_p1 = por %p2098_p0, %p2097_p13 }
  0x5c   : > { %p2093_p12 = pneg %p2092_p11 }
  0x5e   : > { %p2100_p4 = pnand %p2099_p1, %p2093_p12 }
  0x60   : > { %2103 = shalt.err (!%p2100_p4)
}
  0x61   : > { %1943 = dma.hbm_to_vmem [thread:$0]  (!%p2397_p5), %s2712_s7, 16, %s2401_s25, [#allocation12]  }
  0x62   : > { %s37_s29 = sadd.s32 1, %s2282_s14  ;;  %s2293_s30 = smov [#allocation3]  }
  0x63   : > { %p39_p6 = scmp.ge.s32.totalorder %s37_s29, 2  ;;  %s297_s12 = sshll.u32 %s2293_s30, 4  ;;  %s298_s12 = int_to_ptr.vmem [resolvable:$true] %s297_s12 }
  0x64   : > { %s2104_s17 = scalar_lea.hbm %s2690_s1, 768 }
  0x65   : > { %s2718_s29 = smov (%p39_p6, %s37_s29), 0  ;;  %p2105_p8 = scmp.ne.s32.totalorder %s2690_s1, %s2104_s17 }
  0x66   : > { %p2111_p3 = scmp.lt.u32.totalorder %s2104_s17, %s2690_s1 }
  0x67   : > { %p2107_p9 = pnand %p2105_p8, %p2411_p7 }
  0x69   : > { %p2108_p2 = pneg %p2107_p9 }
  0x6b   : > { %p2113_p10 = pnand %p2111_p3, %p2108_p2 }
  0x6d   : > { %2116 = shalt.err (!%p2113_p10)
}
  0x6e   : > { %s2117_s28 = scalar_lea.vmem %s298_s12, 768  ;;  %p2125_p0 = scmp.lt.s32.totalorder %s298_s12, %s298_s12 }
  0x6f   : > { %p2118_p11 = scmp.ne.s32.totalorder %s298_s12, %s2117_s28  ;;  %p2126_p1 = scmp.lt.s32.totalorder %s2117_s28, %s2117_s28 }
  0x71   : > { %p2120_p12 = pnand %p2118_p11, %p2411_p7  ;;  %p2127_p4 = por %p2126_p1, %p2125_p0 }
  0x73   : > { %p2121_p13 = pneg %p2120_p12 }
  0x75   : > { %p2128_p6 = pnand %p2127_p4, %p2121_p13 }
  0x77   : > { %2131 = shalt.err (!%p2128_p6)
}
  0x78   : > { %1928 = dma.hbm_to_vmem [thread:$0]  (!%p2397_p5), %s2690_s1, 768, %s298_s12, [#allocation4], %s2291_s21, %s2291_s21, %s2292_s24  }
  0x79   : > { %s2294_s18 = smov [#allocation7]   ;;  %s2295_s22 = smov [#allocation10]  }
  0x7a   : > { %s322_s17 = sshll.u32 %s2294_s18, 4  ;;  %s349_s26 = sshll.u32 %s2295_s22, 4  ;;  %s323_s17 = int_to_ptr.vmem [resolvable:$true] %s322_s17  ;;  %s350_s26 = int_to_ptr.vmem [resolvable:$true] %s349_s26 }
  0x7b   : > { %s2132_s28 = scalar_lea.hbm %s2692_s3, 16 }
  0x7c   : > { %p2133_p8 = scmp.ne.s32.totalorder %s2692_s3, %s2132_s28  ;;  %p2139_p3 = scmp.lt.u32.totalorder %s2132_s28, %s2692_s3 }
  0x7e   : > { %p2135_p9 = pnand %p2133_p8, %p2411_p7 }
  0x80   : > { %p2136_p2 = pneg %p2135_p9 }
  0x82   : > { %p2141_p10 = pnand %p2139_p3, %p2136_p2 }
  0x84   : > { %2144 = shalt.err (!%p2141_p10)
}
  0x85   : > { %s2145_s12 = scalar_lea.vmem %s323_s17, 16  ;;  %s2152_s16 = scalar_lea.vmem %s323_s17, 32 }
  0x86   : > { %p2146_p11 = scmp.ne.s32.totalorder %s323_s17, %s2145_s12  ;;  %p2153_p0 = scmp.lt.s32.totalorder %s323_s17, %s323_s17 }
  0x87   : > { %p2154_p1 = scmp.lt.s32.totalorder %s2152_s16, %s2145_s12 }
  0x88   : > { %p2148_p12 = pnand %p2146_p11, %p2411_p7 }
  0x89   : > { %p2155_p4 = por %p2154_p1, %p2153_p0 }
  0x8a   : > { %p2149_p13 = pneg %p2148_p12 }
  0x8c   : > { %p2156_p6 = pnand %p2155_p4, %p2149_p13 }
  0x8e   : > { %2159 = shalt.err (!%p2156_p6)
}
  0x8f   : > { %1934 = dma.hbm_to_vmem [thread:$0]  (!%p2397_p5), %s2692_s3, 16, %s323_s17, [#allocation6]  }
  0x90   : > { %s2160_s22 = scalar_lea.hbm %s2695_s6, 16 }
  0x91   : > { %p2161_p8 = scmp.ne.s32.totalorder %s2695_s6, %s2160_s22  ;;  %p2167_p3 = scmp.lt.u32.totalorder %s2160_s22, %s2695_s6 }
  0x93   : > { %p2163_p9 = pnand %p2161_p8, %p2411_p7 }
  0x95   : > { %p2164_p2 = pneg %p2163_p9 }
  0x97   : > { %p2169_p10 = pnand %p2167_p3, %p2164_p2 }
  0x99   : > { %2172 = shalt.err (!%p2169_p10)
}
  0x9a   : > { %s2173_s12 = scalar_lea.vmem %s350_s26, 16  ;;  %s2180_s17 = scalar_lea.vmem %s350_s26, 32 }
  0x9b   : > { %p2174_p11 = scmp.ne.s32.totalorder %s350_s26, %s2173_s12  ;;  %p2181_p0 = scmp.lt.s32.totalorder %s350_s26, %s350_s26 }
  0x9c   : > { %p2182_p1 = scmp.lt.s32.totalorder %s2180_s17, %s2173_s12 }
  0x9d   : > { %p2176_p12 = pnand %p2174_p11, %p2411_p7 }
  0x9e   : > { %p2183_p4 = por %p2182_p1, %p2181_p0 }
  0x9f   : > { %p2177_p13 = pneg %p2176_p12 }
  0xa1   : > { %p2184_p6 = pnand %p2183_p4, %p2177_p13 }
  0xa3   : > { %2187 = shalt.err (!%p2184_p6)
}
  0xa4   : > { %1940 = dma.hbm_to_vmem [thread:$0]  (!%p2397_p5), %s2695_s6, 16, %s350_s26, [#allocation9]  }
  0xa5   : > { %s2296_s4 = smov [#allocation13]   ;;  %s2297_s18 = smov [#allocation14]  }
  0xa6   : > { %s370_s7 = sshll.u32 %s2296_s4, 4  ;;  %s384_s22 = sshll.u32 %s2297_s18, 4  ;;  %s371_s7 = int_to_ptr.vmem [resolvable:$true] %s370_s7  ;;  %s385_s22 = int_to_ptr.vmem [resolvable:$true] %s384_s22 }
  0xa7   : > { %s2188_s28 = scalar_lea.hbm %s2697_s8, 384 }
  0xa8   : > { %p2189_p8 = scmp.ne.s32.totalorder %s2697_s8, %s2188_s28  ;;  %p2195_p3 = scmp.lt.u32.totalorder %s2188_s28, %s2697_s8 }
  0xaa   : > { %p2191_p9 = pnand %p2189_p8, %p2411_p7 }
  0xac   : > { %p2192_p2 = pneg %p2191_p9 }
  0xae   : > { %p2197_p10 = pnand %p2195_p3, %p2192_p2 }
  0xb0   : > { %2200 = shalt.err (!%p2197_p10)
}
  0xb1   : > { %s2201_s26 = scalar_lea.vmem %s371_s7, 384  ;;  %p2209_p0 = scmp.lt.s32.totalorder %s371_s7, %s371_s7 }
  0xb2   : > { %p2202_p11 = scmp.ne.s32.totalorder %s371_s7, %s2201_s26  ;;  %p2210_p1 = scmp.lt.s32.totalorder %s2201_s26, %s2201_s26 }
  0xb4   : > { %p2204_p12 = pnand %p2202_p11, %p2411_p7  ;;  %p2211_p4 = por %p2210_p1, %p2209_p0 }
  0xb6   : > { %p2205_p13 = pneg %p2204_p12 }
  0xb8   : > { %p2212_p6 = pnand %p2211_p4, %p2205_p13 }
  0xba   : > { %2215 = shalt.err (!%p2212_p6)
}
  0xbb   : > { %1946 = dma.hbm_to_vmem [thread:$0]  (!%p2397_p5), %s2697_s8, 384, %s371_s7, [#allocation12], %s2291_s21, %s2291_s21, %s2292_s24  }
  0xbc   : > { %s2216_s25 = scalar_lea.hbm %s2698_s9, 128 }
  0xbd   : > { %p2217_p8 = scmp.ne.s32.totalorder %s2698_s9, %s2216_s25  ;;  %p2223_p3 = scmp.lt.u32.totalorder %s2216_s25, %s2698_s9 }
  0xbf   : > { %p2219_p9 = pnand %p2217_p8, %p2411_p7 }
  0xc1   : > { %p2220_p2 = pneg %p2219_p9 }
  0xc3   : > { %p2225_p10 = pnand %p2223_p3, %p2220_p2 }
  0xc5   : > { %2228 = shalt.err (!%p2225_p10)
}
  0xc6   : > { %s2229_s16 = scalar_lea.vmem %s385_s22, 128  ;;  %p2237_p0 = scmp.lt.s32.totalorder %s385_s22, %s385_s22 }
  0xc7   : > { %p2230_p11 = scmp.ne.s32.totalorder %s385_s22, %s2229_s16  ;;  %p2238_p1 = scmp.lt.s32.totalorder %s2229_s16, %s2229_s16 }
  0xc9   : > { %p2232_p12 = pnand %p2230_p11, %p2411_p7  ;;  %p2239_p4 = por %p2238_p1, %p2237_p0 }
  0xcb   : > { %p2233_p13 = pneg %p2232_p12 }
  0xcd   : > { %p2240_p6 = pnand %p2239_p4, %p2233_p13 }
  0xcf   : > { %2243 = shalt.err (!%p2240_p6)
}
  0xd0   : > { %1949 = dma.hbm_to_vmem [thread:$0]  (!%p2397_p5), %s2698_s9, 128, %s385_s22, [#allocation15]  }
  0xd1   : > { %p2713_p8 = scmp.ne.s32.totalorder %s2707_s20, 0 }
  0xd2   : > { %p2714_p9 = scmp.ne.s32.totalorder (!%p2713_p8), %s2706_s19, 0 }
  0xd3   : > { %409 = sbr.rel (%p2713_p8) target bundleno = 1361 (0x551), region = 60 }
  0xda   : > { %2257 = dma.done.wait (%p2714_p9), [#allocation4], 768  }
  0xdb   : > { %2259 = vsyncadd (%p2714_p9), [#allocation4], 4294966528 }
  0xdc   : > { %2261 = dma.done.wait (%p2714_p9), [#allocation6], 32  }
  0xdd   : > { %2263 = vsyncadd (%p2714_p9), [#allocation6], 4294967264 }
  0xde   : > { %2265 = dma.done.wait (%p2714_p9), [#allocation9], 272  }
  0xdf   : > { %2267 = vsyncadd (%p2714_p9), [#allocation9], 4294967024 }
  0xe0   : > { %2269 = dma.done.wait (%p2714_p9), [#allocation12], 400  }
  0xe1   : > { %2271 = vsyncadd (%p2714_p9), [#allocation12], 4294966896 }
  0xe2   : > { %2273 = dma.done.wait (%p2714_p9), [#allocation15], 128  }
  0xe3   : > { %2275 = vsyncadd (%p2714_p9), [#allocation15], 4294967168  ;;  %s1770_s20 = sshll.u32 %s2278_s13, 3  ;;  %vm560_vm0 = vcmask 1041409   ;;  %vm562_vm1 = vcmask 1042434   ;;  %vm564_vm2 = vcmask 1043459  }
  0xe4   : > { %p478_p5 = scmp.lt.s32.totalorder %s1770_s20, 15  ;;  %vm566_vm3 = vcmask 1044484   ;;  %vm568_vm4 = vcmask 1045509   ;;  %vm570_vm5 = vcmask 1046534   ;;  %vm572_vm6 = vcmask 1047559   ;;  %s2298_s19 = smov 80  }
  0xe5   : > { %s2299_s26 = smov 112   ;;  %s2300_s2 = smov 64   ;;  %v821_v63 = vld [vmem:[#allocation3 + $0x10] sm:$0xff]  ;;  %vm2306_vm7 = vmmov 0   ;;  %vm739_vm8 = vcmask 130048   ;;  %vm1249_vm9 = vcmask 1040384  }
  0xe6   : > { %s2720_s20 = smov (!%p478_p5, %s1770_s20), 15  ;;  %s2301_s4 = smov 96   ;;  %vm1252_vm10 = vcmask 1044480   ;;  %vm1260_vm11 = vcmask 1042432   ;;  %vm1261_vm12 = vcmask 1046532   ;;  %vm1274_vm14 = vcmask 64512  }
  0xe7   : > { %s1771_s23 = sshll.u32 %s2720_s20, 3  ;;  %s2302_s18 = smov 32   ;;  %vm1262_vm13 = vmor %vm1260_vm11, %vm1261_vm12  ;;  %vm1420_vm15 = vcmask 1041408  }
  0xe8   : > { %s484_s22 = scalar_lea.vmem %s2689_s0, %s1771_s23  ;;  %s2303_s27 = smov 48  }
  0xe9   : > { %v496_v0 = vld [vmem:[%s484_s22] sm:$0xff]  ;;  %v497_v1 = vld [vmem:[%s484_s22 + $0x8] sm:$0xff]  ;;  %v498_v2 = vld [vmem:[%s484_s22 + $0x10] sm:$0xff]  ;;  %s2304_s25 = smov 16   ;;  %p486_p7 = scmp.lt.s32.totalorder %s2278_s13, 1 }
  0xea   : > { %v499_v3 = vld [vmem:[%s484_s22 + $0x18] sm:$0xff]  ;;  %v500_v4 = vld [vmem:[%s484_s22 + $0x20] sm:$0xff]  ;;  %v501_v5 = vld [vmem:[%s484_s22 + $0x28] sm:$0xff]  ;;  %v504_v6 = vrot.slane %v496_v0, 4  ;;  %v510_v7 = vrot.slane %v497_v1, 4  ;;  %v516_v8 = vrot.slane %v498_v2, 4 }
  0xeb   : > { %v502_v9 = vld [vmem:[%s484_s22 + $0x30] sm:$0xff]  ;;  %v503_v10 = vld [vmem:[%s484_s22 + $0x38] sm:$0xff]  ;;  %v522_v11 = vrot.slane %v499_v3, 4  ;;  %v528_v12 = vrot.slane %v500_v4, 4  ;;  %v534_v13 = vrot.slane %v501_v5, 4  ;;  %s2722_s13 = smov (!%p486_p7, %s2278_s13), 1 }
  0xec   : > { %v505_v14 = vadd.f32 %v504_v6, %v496_v0  ;;  %v511_v15 = vadd.f32 %v510_v7, %v497_v1  ;;  %v517_v16 = vadd.f32 %v516_v8, %v498_v2  ;;  %v540_v17 = vrot.slane %v502_v9, 4  ;;  %v822_v0 = vld [vmem:[#allocation3 + $0x18] sm:$0xff]  ;;  %s1772_s16 = sshll.u32 %s2722_s13, 3 }
  0xed   : > { %v523_v18 = vadd.f32 %v522_v11, %v499_v3  ;;  %v529_v19 = vadd.f32 %v528_v12, %v500_v4  ;;  %v535_v20 = vadd.f32 %v534_v13, %v501_v5  ;;  %v546_v21 = vrot.slane %v503_v10, 4  ;;  %s489_s20 = scalar_lea.vmem %s2699_s10, %s1772_s16 }
  0xee   : > { %v506_v22 = vrot.slane %v505_v14, 2  ;;  %v512_v23 = vrot.slane %v511_v15, 2  ;;  %v518_v24 = vrot.slane %v517_v16, 2  ;;  %v541_v25 = vadd.f32 %v540_v17, %v502_v9 }
  0xef   : > { %v524_v26 = vrot.slane %v523_v18, 2  ;;  %v530_v27 = vrot.slane %v529_v19, 2  ;;  %v536_v28 = vrot.slane %v535_v20, 2  ;;  %v547_v29 = vadd.f32 %v546_v21, %v503_v10 }
  0xf0   : > { %v507_v30 = vadd.f32 %v506_v22, %v505_v14  ;;  %v513_v31 = vadd.f32 %v512_v23, %v511_v15  ;;  %v519_v32 = vadd.f32 %v518_v24, %v517_v16  ;;  %v542_v33 = vrot.slane %v541_v25, 2 }
  0xf1   : > { %v525_v34 = vadd.f32 %v524_v26, %v523_v18  ;;  %v531_v35 = vadd.f32 %v530_v27, %v529_v19  ;;  %v537_v36 = vadd.f32 %v536_v28, %v535_v20  ;;  %v548_v37 = vrot.slane %v547_v29, 2 }
  0xf2   : > { %v508_v38 = vrot.slane %v507_v30, 1  ;;  %v514_v39 = vrot.slane %v513_v31, 1  ;;  %v520_v40 = vrot.slane %v519_v32, 1  ;;  %v543_v41 = vadd.f32 %v542_v33, %v541_v25 }
  0xf3   : > { %v526_v42 = vrot.slane %v525_v34, 1  ;;  %v532_v43 = vrot.slane %v531_v35, 1  ;;  %v538_v44 = vrot.slane %v537_v36, 1  ;;  %v549_v45 = vadd.f32 %v548_v37, %v547_v29 }
  0xf4   : > { %v509_v46 = vadd.f32 %v508_v38, %v507_v30  ;;  %v515_v47 = vadd.f32 %v514_v39, %v513_v31  ;;  %v521_v48 = vadd.f32 %v520_v40, %v519_v32  ;;  %v544_v49 = vrot.slane %v543_v41, 1 }
  0xf5   : > { %v527_v50 = vadd.f32 %v526_v42, %v525_v34  ;;  %v533_v51 = vadd.f32 %v532_v43, %v531_v35  ;;  %v550_v52 = vrot.slane %v549_v45, 1  ;;  %v539_v53 = vadd.f32 %v538_v44, %v537_v36 }
  0xf6   : > { %v561_v54 = vsel %vm560_vm0, %v515_v47, %v509_v46  ;;  %v545_v55 = vadd.f32 %v544_v49, %v543_v41  ;;  %v2305_v1 = vmov 0.0|0.0   ;;  %v1871_v2 = vpack.c.bf16 %v822_v0, %v821_v63 }
  0xf7   : > { %v563_v56 = vsel %vm562_vm1, %v521_v48, %v561_v54  ;;  %v551_v57 = vadd.f32 %v550_v52, %v549_v45  ;;  %1870 = vmatprep.subr.bf16.mxu0 %v2305_v1  ;;  %v2307_v3 = vmov 0.0   ;;  %1879 = vmatprep.subr.bf16.mxu1 %v2305_v1  ;;  %v2308_v5 = vmov 1983009808  }
  0xf8   : > { %v565_v58 = vsel %vm564_vm2, %v527_v50, %v563_v56  ;;  %1819 = vmatprep.mubr.msk.f32.mxu0 %vm2306_vm7, %v2307_v3  ;;  %1840 = vmatprep.mubr.msk.f32.mxu1 %vm2306_vm7, %v2307_v3  ;;  %v606_v6 = vunpack.c.l.s4 %v2308_v5  ;;  %v608_v7 = vlaneseq  ;;  %v2309_v13 = vmov 1934713408  }
  0xf9   : > { %v567_v59 = vsel %vm566_vm3, %v533_v51, %v565_v58  ;;  %1872 = vmatpush3.bf16.msra.mxu0 %v1871_v2  ;;  %v670_v14 = vunpack.c.l.s4 %v2309_v13 }
  0xfa   : > { %v569_v60 = vsel %vm568_vm4, %v539_v53, %v567_v59  ;;  %1873 = vmatprep.subr.bf16.mxu0 %v2305_v1  ;;  %v607_v9 = vunpack.c.0.s8 %v606_v6  ;;  %v609_v10 = vshrl.u32 %v608_v7, 7 }
  0xfb   : > { %v571_v61 = vsel %vm570_vm5, %v545_v55, %v569_v60  ;;  %v671_v22 = vunpack.c.0.s8 %v670_v14 }
  0xfc   : > { %v573_v62 = vsel %vm572_vm6, %v551_v57, %v571_v61  ;;  %v610_v16 = vsub.s32 %v607_v9, %v609_v10 }
  0xfd   : > { %588 = vrot.lane.b32.xlu1 %v573_v62, %s2298_s19  ;;  %582 = vrot.lane.b32.xlu0 %v573_v62, %s2299_s26  ;;  %v674_v32 = vsub.s32 %v671_v22, %v609_v10 }
 0x101   : > { %591 = vrot.lane.b32.xlu1 %v573_v62, %s2300_s2  ;;  %585 = vrot.lane.b32.xlu0 %v573_v62, %s2301_s4 }
 0x105   : > { %597 = vrot.lane.b32.xlu1 %v573_v62, %s2302_s18  ;;  %594 = vrot.lane.b32.xlu0 %v573_v62, %s2303_s27 }
 0x109   : > { %600 = vrot.lane.b32.xlu0 %v573_v62, %s2304_s25 }
 0x16f   : > { %v589_v4 = vpop.permute.xlu1 %588  ;;  %v583_v8 = vpop.permute.xlu0 %582 }
 0x170   : > { %v619_v17 = vcombine.low %v583_v8, %v589_v4  ;;  %v620_v21 = vcombine.high %v583_v8, %v589_v4 }
 0x172   : > { %v627_v26 = vrot.slane %v619_v17, %v610_v16  ;;  %v634_v31 = vrot.slane %v620_v21, %v610_v16 }
 0x173   : > { %v592_v11 = vpop.permute.xlu1 %591  ;;  %v586_v12 = vpop.permute.xlu0 %585 }
 0x174   : > { %v603_v15 = vcombine.low %v573_v62, %v586_v12  ;;  %v604_v18 = vcombine.high %v573_v62, %v586_v12 }
 0x176   : > { %v611_v23 = vrot.slane %v603_v15, %v610_v16  ;;  %v618_v27 = vrot.slane %v604_v18, %v610_v16 }
 0x177   : > { %v598_v19 = vpop.permute.xlu1 %597  ;;  %v595_v20 = vpop.permute.xlu0 %594 }
 0x178   : > { %v635_v24 = vcombine.low %v592_v11, %v598_v19  ;;  %v636_v25 = vcombine.high %v592_v11, %v598_v19  ;;  %v667_v33 = vcombine.low %v611_v23, %v627_v26  ;;  %v668_v34 = vcombine.high %v611_v23, %v627_v26 }
 0x179   : > { %v683_v39 = vcombine.low %v618_v27, %v634_v31  ;;  %v684_v40 = vcombine.high %v618_v27, %v634_v31 }
 0x17a   : > { %v643_v35 = vrot.slane %v635_v24, %v610_v16  ;;  %v650_v36 = vrot.slane %v636_v25, %v610_v16  ;;  %v675_v45 = vrot.slane %v667_v33, %v674_v32  ;;  %v682_v46 = vrot.slane %v668_v34, %v674_v32 }
 0x17b   : > { %v601_v28 = vpop.permute.xlu0 %600  ;;  %v691_v51 = vrot.slane %v683_v39, %v674_v32  ;;  %v698_v52 = vrot.slane %v684_v40, %v674_v32 }
 0x17c   : > { %v651_v29 = vcombine.low %v595_v20, %v601_v28  ;;  %v652_v30 = vcombine.high %v595_v20, %v601_v28 }
 0x17e   : > { %v659_v37 = vrot.slane %v651_v29, %v610_v16  ;;  %v666_v38 = vrot.slane %v652_v30, %v610_v16 }
 0x180   : > { %v699_v41 = vcombine.low %v643_v35, %v659_v37  ;;  %v700_v42 = vcombine.high %v643_v35, %v659_v37  ;;  %v715_v43 = vcombine.low %v650_v36, %v666_v38  ;;  %v716_v44 = vcombine.high %v650_v36, %v666_v38 }
 0x182   : > { %v707_v47 = vrot.slane %v699_v41, %v674_v32  ;;  %v714_v48 = vrot.slane %v700_v42, %v674_v32  ;;  %v723_v49 = vrot.slane %v715_v43, %v674_v32  ;;  %v730_v50 = vrot.slane %v716_v44, %v674_v32 }
 0x184   : > { %v731_v53 = vcombine.low %v675_v45, %v707_v47  ;;  %v732_v54 = vcombine.high %v675_v45, %v707_v47  ;;  %v733_v55 = vcombine.low %v682_v46, %v714_v48  ;;  %v734_v56 = vcombine.high %v682_v46, %v714_v48 }
 0x185   : > { %v735_v57 = vcombine.low %v691_v51, %v723_v49  ;;  %v736_v58 = vcombine.high %v691_v51, %v723_v49  ;;  %v737_v59 = vcombine.low %v698_v52, %v730_v50  ;;  %v738_v60 = vcombine.high %v698_v52, %v730_v50 }
 0x186   : > { %v740_v61 = vsel %vm739_vm8, %v731_v53, 0.0  ;;  %v747_v62 = vsel %vm739_vm8, %v732_v54, 0.0  ;;  %v754_v63 = vsel %vm739_vm8, %v733_v55, 0.0  ;;  %v761_v0 = vsel %vm739_vm8, %v734_v56, 0.0 }
 0x187   : > { %v741_v2 = vrot.slane %v740_v61, 4  ;;  %v748_v4 = vrot.slane %v747_v62, 4  ;;  %v755_v5 = vrot.slane %v754_v63, 4  ;;  %v762_v6 = vrot.slane %v761_v0, 4 }
 0x188   : > { %v768_v7 = vsel %vm739_vm8, %v735_v57, 0.0  ;;  %v775_v8 = vsel %vm739_vm8, %v736_v58, 0.0  ;;  %v782_v9 = vsel %vm739_vm8, %v737_v59, 0.0  ;;  %v789_v10 = vsel %vm739_vm8, %v738_v60, 0.0 }
 0x189   : > { %v742_v11 = vadd.f32 %v741_v2, %v740_v61  ;;  %v749_v12 = vadd.f32 %v748_v4, %v747_v62  ;;  %v756_v13 = vadd.f32 %v755_v5, %v754_v63  ;;  %v763_v14 = vadd.f32 %v762_v6, %v761_v0  ;;  %v818_v0 = vld [vmem:[#allocation3] sm:$0xff]  ;;  %v819_v2 = vld [vmem:[#allocation3 + $0x8] sm:$0xff] }
 0x18a   : > { %v769_v15 = vrot.slane %v768_v7, 4  ;;  %v776_v16 = vrot.slane %v775_v8, 4  ;;  %v783_v17 = vrot.slane %v782_v9, 4  ;;  %v790_v18 = vrot.slane %v789_v10, 4 }
 0x18b   : > { %v743_v19 = vrot.slane %v742_v11, 2  ;;  %v750_v20 = vrot.slane %v749_v12, 2  ;;  %v757_v21 = vrot.slane %v756_v13, 2  ;;  %v764_v22 = vrot.slane %v763_v14, 2 }
 0x18c   : > { %v770_v23 = vadd.f32 %v769_v15, %v768_v7  ;;  %v777_v24 = vadd.f32 %v776_v16, %v775_v8  ;;  %v784_v25 = vadd.f32 %v783_v17, %v782_v9  ;;  %v791_v26 = vadd.f32 %v790_v18, %v789_v10  ;;  %v971_v15 = vld [vmem:[#allocation3 + $0x20] sm:$0xff]  ;;  %v972_v16 = vld [vmem:[#allocation3 + $0x28] sm:$0xff] }
 0x18d   : > { %v744_v27 = vadd.f32 %v743_v19, %v742_v11  ;;  %v751_v28 = vadd.f32 %v750_v20, %v749_v12  ;;  %v758_v29 = vadd.f32 %v757_v21, %v756_v13  ;;  %v765_v30 = vadd.f32 %v764_v22, %v763_v14  ;;  %v1063_v20 = vld [vmem:[#allocation8] sm:$0xff]  ;;  %v1064_v21 = vld [vmem:[#allocation8 + $0x8] sm:$0xff] }
 0x18e   : > { %v771_v31 = vrot.slane %v770_v23, 2  ;;  %v778_v32 = vrot.slane %v777_v24, 2  ;;  %v785_v33 = vrot.slane %v784_v25, 2  ;;  %v792_v34 = vrot.slane %v791_v26, 2 }
 0x18f   : > { %v745_v35 = vrot.slane %v744_v27, 1  ;;  %v752_v36 = vrot.slane %v751_v28, 1  ;;  %v759_v37 = vrot.slane %v758_v29, 1  ;;  %v766_v38 = vrot.slane %v765_v30, 1 }
 0x190   : > { %v772_v39 = vadd.f32 %v771_v31, %v770_v23  ;;  %v779_v40 = vadd.f32 %v778_v32, %v777_v24  ;;  %v786_v41 = vadd.f32 %v785_v33, %v784_v25  ;;  %v793_v42 = vadd.f32 %v792_v34, %v791_v26  ;;  %v1776_v23 = vld [vmem:[#allocation5] ss:$0 sm:$0xff]  ;;  %v1147_v24 = vld [vmem:[%s2694_s5] sm:$0xff]  ;;  %v1148_v25 = vld [vmem:[%s2694_s5 + $0x8] sm:$0xff] }
 0x191   : > { %v746_v43 = vadd.f32 %v745_v35, %v744_v27  ;;  %v753_v44 = vadd.f32 %v752_v36, %v751_v28  ;;  %v760_v45 = vadd.f32 %v759_v37, %v758_v29  ;;  %v767_v46 = vadd.f32 %v766_v38, %v765_v30  ;;  %v1777_v27 = vld [vmem:[#allocation7] ss:$0 sm:$0xff]  ;;  %v1780_v34 = vld [vmem:[#allocation10] ss:$0 sm:$0xff]  ;;  %v1781_v36 = vld [vmem:[#allocation11] ss:$0 sm:$0xff] }
 0x192   : > { %v773_v47 = vrot.slane %v772_v39, 1  ;;  %v780_v48 = vrot.slane %v779_v40, 1  ;;  %v787_v49 = vrot.slane %v786_v41, 1  ;;  %v794_v50 = vrot.slane %v793_v42, 1 }
 0x193   : > { %v796_v51 = vmul.f32 0.015625, %v746_v43  ;;  %v797_v52 = vmul.f32 0.015625, %v753_v44  ;;  %v798_v53 = vmul.f32 0.015625, %v760_v45  ;;  %v799_v61 = vmul.f32 0.015625, %v767_v46 }
 0x194   : > { %v774_v54 = vadd.f32 %v773_v47, %v772_v39  ;;  %v781_v55 = vadd.f32 %v780_v48, %v779_v40  ;;  %v788_v56 = vadd.f32 %v787_v49, %v786_v41  ;;  %v795_v57 = vadd.f32 %v794_v50, %v793_v42 }
 0x195   : > { %v812_v58 = vsel %vm560_vm0, %v797_v52, %v796_v51  ;;  %v1874_v10 = vpack.c.bf16 %v819_v2, %v818_v0  ;;  %v1877_v17 = vpack.c.bf16 %v972_v16, %v971_v15  ;;  %v1880_v22 = vpack.c.bf16 %v1064_v21, %v1063_v20 }
 0x196   : > { %v800_v59 = vmul.f32 0.015625, %v774_v54  ;;  %v801_v60 = vmul.f32 0.015625, %v781_v55  ;;  %v802_v62 = vmul.f32 0.015625, %v788_v56  ;;  %v813_v63 = vsel %vm562_vm1, %v798_v53, %v812_v58 }
 0x197   : > { %v803_v4 = vmul.f32 0.015625, %v795_v57  ;;  %v814_v5 = vsel %vm564_vm2, %v799_v61, %v813_v63  ;;  %1881 = vmatpush3.bf16.msra.mxu1 %v1880_v22  ;;  %v1883_v30 = vpack.c.bf16 %v1148_v25, %v1147_v24  ;;  %v1255_v57 = vld [vmem:[#allocation13] sm:$0xff] }
 0x198   : > { %v815_v6 = vsel %vm560_vm0, %v801_v60, %v800_v59  ;;  %v1149_v8 = vsel %vm566_vm3, %v800_v59, %v814_v5  ;;  %v897_v18 = vcombine.low %v2307_v3, %v814_v5  ;;  %1882 = vmatprep.subr.bf16.mxu1 %v2305_v1  ;;  %v1432_v59 = vld [vmem:[#allocation13 + $0x10] sm:$0xff]  ;;  %vm1421_vm0 = vcmask 1045508  }
 0x199   : > { %v816_v7 = vsel %vm562_vm1, %v802_v62, %v815_v6  ;;  %v1150_v11 = vsel %vm568_vm4, %v801_v60, %v1149_v8  ;;  %vm1422_vm1 = vmor %vm1420_vm15, %vm1421_vm0 }
 0x19a   : > { %v817_v9 = vsel %vm564_vm2, %v803_v4, %v816_v7  ;;  %v1151_v13 = vsel %vm570_vm5, %v802_v62, %v1150_v11 }
 0x19b   : > { %v823_v12 = vcombine.low %v814_v5, %v817_v9  ;;  %v1152_v14 = vsel %vm572_vm6, %v803_v4, %v1151_v13  ;;  %v973_v19 = vcombine.low %v817_v9, %v2307_v3  ;;  %v1518_v5 = vld [vmem:[#allocation14] sm:$0xff] }
 0x19d   : > { %1820 = vmatmul.mubr.msk.f32.vlgmr.msra.gmra.mrb[0].mxu0 %vm739_vm8, %v823_v12 }
 0x19e   : > { %1875 = vmatpush3.bf16.msra.mxu0 %v1874_v10  ;;  %1826 = vmatprep.mubr.msk.f32.mxu0 %vm2306_vm7, %v2307_v3 }
 0x19f   : > { %1876 = vmatprep.subr.bf16.mxu0 %v2305_v1  ;;  %v1272_v1 = vld [vmem:[#allocation13 + $0x8] sm:$0xff] }
 0x1a5   : > { %1827 = vmatmul.mubr.msk.f32.vlgmr.msra.gmra.mrb[0].mxu0 %vm739_vm8, %v897_v18 }
 0x1a6   : > { %1878 = vmatpush3.bf16.msra.mxu0 %v1877_v17  ;;  %1833 = vmatprep.mubr.msk.f32.mxu0 %vm2306_vm7, %v2307_v3 }
 0x1a7   : > { %1865 = vmatprep.subr.mxu0 %v2307_v3 }
 0x1ad   : > { %1834 = vmatmul.mubr.msk.f32.vlgmr.msra.gmra.mrb[0].mxu0 %vm739_vm8, %v973_v19 }
 0x1ae   : > { %1867 = vmatprep.mubr.msk.f32.mxu0 %vm2306_vm7, %v2307_v3  ;;  %1866 = vmatpush3.msra.mxu0 %v1518_v5 }
 0x280   : > { %v1042_v26 = vpop.f32.mrb[0].mxu0 }
 0x281   : > { %v1054_v28 = vmul.f32 %v1776_v23, %v1042_v26  ;;  %v1835_v29 = vpop.f32.mrb[1].mxu0 }
 0x283   : > { %v1062_v31 = vadd.f32 %v1777_v27, %v1054_v28 }
 0x285   : > { %1841 = vmatmul.mubr.msk.f32.vlgmr.msra.gmra.mrb[0].mxu1 %vm739_vm8, %v1062_v31 }
 0x286   : > { %1884 = vmatpush3.bf16.msra.mxu1 %v1883_v30  ;;  %1847 = vmatprep.mubr.msk.f32.mxu1 %vm2306_vm7, %v2307_v3 }
 0x287   : > { %1850 = vmatprep.subr.mxu1 %v2307_v3 }
 0x289   : > { %1848 = vmatmul.mubr.msk.f32.vlgmr.msra.gmra.mrb[2].mxu1 %vm739_vm8, %v1152_v14 }
 0x28a   : > { %1852 = vmatprep.mubr.msk.f32.mxu1 %vm2306_vm7, %v2307_v3  ;;  %1851 = vmatpush3.msra.mxu1 %v1272_v1 }
 0x28b   : > { %1855 = vmatprep.subr.mxu1 %v2307_v3 }
 0x358   : > { %v2662_v32 = vpop.f32.mrb[0].mxu1 }
 0x359   : > { %v1842_v33 = vpop.f32.mrb[1].mxu1 }
 0x35c   : > { %v1221_v35 = vpop.f32.mrb[2].mxu1 }
 0x35d   : > { %v1232_v37 = vmul.f32 %v1780_v34, %v1221_v35  ;;  %v1849_v38 = vpop.f32.mrb[3].mxu1 }
 0x35f   : > { %v1240_v39 = vadd.f32 %v1781_v36, %v1232_v37 }
 0x361   : > { %v1241_v40 = vmax.f32 %v1240_v39, 0.0 }
 0x363   : > { %v1243_v41 = vcombine.high %v1241_v40, %v1241_v40  ;;  %v1245_v42 = vrot.slane %v1241_v40, 7 }
 0x365   : > { %v1246_v43 = vrot.slane %v1243_v41, 7  ;;  %v1250_v44 = vsel %vm1249_vm9, 0.0, %v1245_v42 }
 0x366   : > { %v1253_v45 = vsel %vm1252_vm10, %v1250_v44, 0.0 }
 0x367   : > { %v1251_v46 = vsel %vm1249_vm9, 0.0, %v1246_v43  ;;  %v1258_v47 = vcombine.high %v1253_v45, %v1253_v45  ;;  %v1782_v51 = vrot.slane %v1253_v45, 9  ;;  %v1786_v63 = vrot.slane %v1253_v45, 10 }
 0x368   : > { %v1254_v48 = vsel %vm1252_vm10, %v1251_v46, 0.0 }
 0x369   : > { %v1259_v49 = vcombine.high %v1254_v48, %v1254_v48  ;;  %v1265_v50 = vrot.slane %v1258_v47, 5  ;;  %v1783_v52 = vrot.slane %v1254_v48, 9  ;;  %v1347_v58 = vcombine.low %v1253_v45, %v1254_v48 }
 0x36a   : > { %v1425_v61 = vrot.slane %v1258_v47, 6  ;;  %v1787_v62 = vrot.slane %v1254_v48, 10 }
 0x36b   : > { %v1269_v53 = vrot.slane %v1259_v49, 5  ;;  %v1266_v54 = vsel %vm1262_vm13, %v1782_v51, %v1265_v50  ;;  %v1429_v60 = vrot.slane %v1259_v49, 6 }
 0x36c   : > { %v1426_v2 = vsel %vm1422_vm1, %v1786_v63, %v1425_v61 }
 0x36d   : > { %v1270_v55 = vsel %vm1262_vm13, %v1783_v52, %v1269_v53  ;;  %v1430_v0 = vsel %vm1422_vm1, %v1787_v62, %v1429_v60 }
 0x36e   : > { %v1273_v56 = vcombine.low %v1266_v54, %v1270_v55  ;;  %v1433_v4 = vcombine.low %v1426_v2, %v1430_v0 }
 0x370   : > { %1853 = vmatmul.mubr.msk.f32.vlgmr.msra.gmra.mrb[4].mxu1 %vm1274_vm14, %v1273_v56 }
 0x371   : > { %1856 = vmatpush3.msra.mxu1 %v1255_v57  ;;  %1857 = vmatprep.mubr.msk.f32.mxu1 %vm2306_vm7, %v2307_v3 }
 0x372   : > { %1860 = vmatprep.subr.mxu1 %v2307_v3 }
 0x378   : > { %1858 = vmatmul.mubr.msk.f32.vlgmr.msra.gmra.mrb[4].mxu1 %vm1274_vm14, %v1347_v58 }
 0x379   : > { %1861 = vmatpush3.msra.mxu1 %v1432_v59  ;;  %1862 = vmatprep.mubr.msk.f32.mxu1 %vm2306_vm7, %v2307_v3  ;;  %v1138_v3 = vsub.f32 0.0, %v2662_v32 }
 0x37b   : > { %v1139_v13 = vmul.f32 1.442695, %v1138_v3 }
 0x37d   : > { %2012 = vpow2.f32 %v1139_v13 }
 0x380   : > { %1863 = vmatmul.mubr.msk.f32.vlgmr.msra.gmra.mrb[4].mxu1 %vm1274_vm14, %v1433_v4 }
 0x387   : > { %v2013_v18 = vpop.eup %2012 }
 0x388   : > { %v1141_v19 = vadd.f32 1.0, %v2013_v18 }
 0x453   : > { %v1502_v6 = vpop.f32.mrb[4].mxu1 }
 0x454   : > { %v1508_v7 = vcombine.high %v1502_v6, %v1502_v6  ;;  %v1864_v8 = vpop.f32.mrb[5].mxu1  ;;  %v1515_v10 = vsub.f32 %v1243_v41, %v1502_v6 }
 0x456   : > { %v1512_v9 = vsub.f32 %v1241_v40, %v1508_v7 }
 0x458   : > { %v1516_v11 = vadd.f32 %v1515_v10, %v1512_v9 }
 0x45a   : > { %v1517_v12 = vmul.f32 0.5, %v1516_v11 }
 0x45c   : > { %1868 = vmatmul.mubr.msk.f32.vlgmr.msra.gmra.mrb[2].mxu0 %vm1274_vm14, %v1517_v12 }
 0x52f   : > { %v1588_v14 = vpop.f32.mrb[2].mxu0 }
 0x530   : > { %v1592_v15 = vsub.f32 0.0, %v1588_v14  ;;  %v1869_v16 = vpop.f32.mrb[3].mxu0 }
 0x532   : > { %v1593_v17 = vmul.f32 1.442695, %v1592_v15 }
 0x534   : > { %2014 = vpow2.f32 %v1593_v17 }
 0x535   : > { %2016 = vrcp.f32 %v1141_v19 }
 0x53e   : > { %v2015_v20 = vpop.eup %2014 }
 0x53f   : > { %v1595_v21 = vadd.f32 1.0, %v2015_v20  ;;  %v2017_v22 = vpop.eup %2016 }
 0x540   : > { %v1145_v23 = vcombine.high %v2017_v22, %v2017_v22 }
 0x541   : > { %2018 = vrcp.f32 %v1595_v21 }
 0x54b   : > { %v2019_v24 = vpop.eup %2018 }
 0x54c   : > { %v1598_v25 = vmul.f32 %v2019_v24, %v2017_v22  ;;  %v1599_v26 = vmul.f32 %v2019_v24, %v1145_v23 }
 0x54e   : > { %v1602_v27 = vcombine.low %v1598_v25, %v1599_v26 }
 0x550   : > { %1604 = vst.msk [vmem:[%s489_s20] sm:$0xff] %vm739_vm8, %v1602_v27 }
 0x551 PF: > { %s25_s15 = sadd.s32 1, %s2286_s15   ;;  %s2715_s13 = smov %s2282_s14 }
 0x552   : > { %p22_p2 = scmp.ge.s32.totalorder %s25_s15, 4   ;;  %s2716_s14 = smov %s2718_s29 }
 0x554   :  { %24 = sbr.rel (!%p22_p2) target bundleno = 10 (0xa), region = 135 }
 0x55b   :  { %1624 = vsyncpa [#allocation4], 1 }
 0x55c   :  { %1626 = vsyncpa [#allocation4 + $0x1], 1 }
 0x55d   :  { %1627 = vsyncpa [#allocation6], 1 }
 0x55e   :  { %1628 = vsyncpa [#allocation9], 1 }
 0x55f   :  { %1629 = vsyncpa [#allocation12], 1 }
 0x560   :  { %1630 = vsyncpa [#allocation15], 1 }

// kernel: inter_sim_forward.3
= control target key start
LH: loop header
LB: loop body
LE: loop exit
PB: predicated region body
PF: predicated region fallthrough
CT: control target
= control target key end

     0   :  { %s1092_s18 = smov 0   ;;  %s1291_s0 = inlined_call_operand.vmem [shape: f32[16,8,128], index: 0, kind: input, shape index: {}]   ;;  %s1292_s1 = inlined_call_operand.vmem [shape: f32[16,1,16], index: 1, kind: input, shape index: {}]   ;;  %s1293_s2 = inlined_call_operand.vmem [shape: f32[3,128,128], index: 2, kind: input, shape index: {}]   ;;  %s1294_s3 = inlined_call_operand.vmem [shape: f32[1,128], index: 3, kind: input, shape index: {}]   ;;  %s1295_s4 = inlined_call_operand.vmem [shape: f32[1,128], index: 4, kind: input, shape index: {}]   ;;  %s1296_s5 = inlined_call_operand.vmem [shape: f32[16,8,128], index: 5, kind: output, shape index: {}]  }
   0x1 LB: > { %s729_s19 = sadd.s32 4294967295, %s1052_s18   ;;  %p733_p0 = scmp.ge.s32.totalorder %s1052_s18, 1  ;;  %s1052_s18 = sphi %s1092_s18, %s15_s18  }
   0x2   : > { %p198_p1 = scmp.lt.s32.totalorder %s1052_s18, 9 }
   0x4   : > { %p199_p2 = pnand %p733_p0, %p198_p1 }
   0x5   : > { %s734_s20 = sshll.u32 (!%p199_p2), %s729_s19, 1  ;;  %v255_v0 = vlaneseq (!%p199_p2)  ;;  %v345_v1 = vld [vmem:[%s1293_s2] sm:$0xff] (!%p199_p2)  ;;  %v346_v2 = vld [vmem:[%s1293_s2 + $0x8] sm:$0xff] (!%p199_p2)  ;;  %v1054_v3 = vmov (!%p199_p2), 1966171168   ;;  %v347_v8 = vld [vmem:[%s1293_s2 + $0x10] sm:$0xff] (!%p199_p2) }
   0x6   : > { %202 = sbr.rel (%p199_p2) target bundleno = 419 (0x1a3), region = 40  ;;  %p231_p3 = scmp.lt.s32.totalorder (!%p199_p2), %s734_s20, 15  ;;  %v253_v4 = vunpack.c.l.s4 (!%p199_p2), %v1054_v3  ;;  %v934_v5 = vpack.c.bf16 (!%p199_p2), %v346_v2, %v345_v1  ;;  %v739_v6 = vld [vmem:[%s1293_s2 + $0x80] sm:$0xff] (!%p199_p2)  ;;  %v740_v7 = vld [vmem:[%s1293_s2 + $0x88] sm:$0xff] (!%p199_p2)  ;;  %v348_v11 = vld [vmem:[%s1293_s2 + $0x18] sm:$0xff] (!%p199_p2)  ;;  %vm288_vm0 = vcmask (!%p199_p2), 130048  }
   0x7   : > { %v1115_v9 = vshrl.u32 (!%p199_p2), %v255_v0, 7  ;;  %v966_v10 = vpack.c.bf16 (!%p199_p2), %v740_v7, %v739_v6  ;;  %v741_v12 = vld [vmem:[%s1293_s2 + $0x90] sm:$0xff] (!%p199_p2)  ;;  %v742_v13 = vld [vmem:[%s1293_s2 + $0x98] sm:$0xff] (!%p199_p2)  ;;  %v938_v15 = vpack.c.bf16 (!%p199_p2), %v348_v11, %v347_v8  ;;  %v349_v17 = vld [vmem:[%s1293_s2 + $0x20] sm:$0xff] (!%p199_p2)  ;;  %s1055_s16 = smov (!%p199_p2), 16   ;;  %s1056_s17 = smov (!%p199_p2), 48  }
   0x8   : > { %v254_v14 = vunpack.c.0.s8 (!%p199_p2), %v253_v4  ;;  %935 = vmatprep.subr.bf16.mxu0 (!%p199_p2), %v934_v5  ;;  %v970_v16 = vpack.c.bf16 (!%p199_p2), %v742_v13, %v741_v12  ;;  %v350_v18 = vld [vmem:[%s1293_s2 + $0x28] sm:$0xff] (!%p199_p2)  ;;  %v743_v19 = vld [vmem:[%s1293_s2 + $0xa0] sm:$0xff] (!%p199_p2)  ;;  %v351_v27 = vld [vmem:[%s1293_s2 + $0x30] sm:$0xff] (!%p199_p2)  ;;  %s1057_s28 = smov (!%p199_p2), 32   ;;  %s1058_s29 = smov (!%p199_p2), 64   ;;  %vm290_vm1 = vcmask (!%p199_p2), 261120  }
   0x9   : > { %937 = vmatpush3.bf16.msra.mxu0 (!%p199_p2), %v934_v5  ;;  %967 = vmatprep.subr.bf16.mxu1 (!%p199_p2), %v966_v10  ;;  %v744_v20 = vld [vmem:[%s1293_s2 + $0xa8] sm:$0xff] (!%p199_p2)  ;;  %v942_v22 = vpack.c.bf16 (!%p199_p2), %v350_v18, %v349_v17  ;;  %v352_v28 = vld [vmem:[%s1293_s2 + $0x38] sm:$0xff] (!%p199_p2)  ;;  %v745_v29 = vld [vmem:[%s1293_s2 + $0xb0] sm:$0xff] (!%p199_p2)  ;;  %s1059_s13 = smov (!%p199_p2), 80   ;;  %s1060_s14 = smov (!%p199_p2), 96   ;;  %vm292_vm2 = vcmask (!%p199_p2), 392192  }
   0xa   : > { %v1145_v21 = vsub.s32 (!%p199_p2), %v254_v14, %v1115_v9  ;;  %969 = vmatpush3.bf16.msra.mxu1 (!%p199_p2), %v966_v10  ;;  %939 = vmatprep.subr.bf16.mxu0 (!%p199_p2), %v938_v15  ;;  %v974_v25 = vpack.c.bf16 (!%p199_p2), %v744_v20, %v743_v19  ;;  %v746_v30 = vld [vmem:[%s1293_s2 + $0xb8] sm:$0xff] (!%p199_p2)  ;;  %v946_v32 = vpack.c.bf16 (!%p199_p2), %v352_v28, %v351_v27  ;;  %v353_v35 = vld [vmem:[%s1293_s2 + $0x40] sm:$0xff] (!%p199_p2)  ;;  %v354_v36 = vld [vmem:[%s1293_s2 + $0x48] sm:$0xff] (!%p199_p2)  ;;  %s1061_s25 = smov (!%p199_p2), 112   ;;  %vm294_vm3 = vcmask (!%p199_p2), 523264  }
   0xb   : > { %971 = vmatprep.subr.bf16.mxu1 (!%p199_p2), %v970_v16  ;;  %v978_v34 = vpack.c.bf16 (!%p199_p2), %v746_v30, %v745_v29  ;;  %v747_v37 = vld [vmem:[%s1293_s2 + $0xc0] sm:$0xff] (!%p199_p2)  ;;  %v748_v38 = vld [vmem:[%s1293_s2 + $0xc8] sm:$0xff] (!%p199_p2)  ;;  %v950_v39 = vpack.c.bf16 (!%p199_p2), %v354_v36, %v353_v35  ;;  %v355_v41 = vld [vmem:[%s1293_s2 + $0x50] sm:$0xff] (!%p199_p2)  ;;  %vm296_vm4 = vcmask (!%p199_p2), 654336   ;;  %vm298_vm5 = vcmask (!%p199_p2), 785408  }
   0xc   : > { %v982_v40 = vpack.c.bf16 (!%p199_p2), %v748_v38, %v747_v37  ;;  %v356_v42 = vld [vmem:[%s1293_s2 + $0x58] sm:$0xff] (!%p199_p2)  ;;  %v749_v43 = vld [vmem:[%s1293_s2 + $0xd0] sm:$0xff] (!%p199_p2)  ;;  %v357_v46 = vld [vmem:[%s1293_s2 + $0x60] sm:$0xff] (!%p199_p2)  ;;  %vm300_vm6 = vcmask (!%p199_p2), 916480   ;;  %vm626_vm7 = vcmask (!%p199_p2), 1040384   ;;  %vm637_vm8 = vcmask (!%p199_p2), 1046528  }
   0xd   : > { %s1298_s20 = smov (!%p231_p3, %s734_s20), 15  ;;  %941 = vmatpush3.bf16.msra.mxu0 %v938_v15  ;;  %v750_v44 = vld [vmem:[%s1293_s2 + $0xd8] sm:$0xff]  ;;  %v954_v45 = vpack.c.bf16 %v356_v42, %v355_v41  ;;  %v358_v47 = vld [vmem:[%s1293_s2 + $0x68] sm:$0xff]  ;;  %v751_v49 = vld [vmem:[%s1293_s2 + $0xe0] sm:$0xff] }
   0xe   : > { %s239_s24 = scalar_lea.vmem %s1292_s1, %s1298_s20  ;;  %973 = vmatpush3.bf16.msra.mxu1 %v970_v16  ;;  %943 = vmatprep.subr.bf16.mxu0 %v942_v22  ;;  %v986_v48 = vpack.c.bf16 %v750_v44, %v749_v43  ;;  %v752_v50 = vld [vmem:[%s1293_s2 + $0xe8] sm:$0xff]  ;;  %v958_v51 = vpack.c.bf16 %v358_v47, %v357_v46  ;;  %v359_v52 = vld [vmem:[%s1293_s2 + $0x70] sm:$0xff]  ;;  %v360_v53 = vld [vmem:[%s1293_s2 + $0x78] sm:$0xff]  ;;  %s735_s30 = sshll.u32 %s1298_s20, 3  ;;  %v335_v16 = vsub.s32 0, %v1115_v9 }
   0xf   : > { %v247_v23 = vld [vmem:[%s239_s24] sm:$0x1]  ;;  %v248_v24 = vld [vmem:[%s239_s24 + $0x1] sm:$0x1]  ;;  %975 = vmatprep.subr.bf16.mxu1 %v974_v25  ;;  %v990_v54 = vpack.c.bf16 %v752_v50, %v751_v49  ;;  %v753_v55 = vld [vmem:[%s1293_s2 + $0xf0] sm:$0xff]  ;;  %v962_v57 = vpack.c.bf16 %v360_v53, %v359_v52  ;;  %s234_s8 = scalar_lea.vmem %s1291_s0, %s735_s30  ;;  %s245_s23 = scalar_lea.vmem %s1296_s5, %s735_s30 }
  0x10   : > { %v251_v26 = vcombine.low %v247_v23, %v248_v24  ;;  %v754_v56 = vld [vmem:[%s1293_s2 + $0xf8] sm:$0xff]  ;;  %v755_v58 = vld [vmem:[%s1293_s2 + $0x100] sm:$0xff]  ;;  %v756_v59 = vld [vmem:[%s1293_s2 + $0x108] sm:$0xff] }
  0x11   : > { %945 = vmatpush3.bf16.msra.mxu0 %v942_v22  ;;  %v994_v60 = vpack.c.bf16 %v754_v56, %v753_v55  ;;  %v998_v61 = vpack.c.bf16 %v756_v59, %v755_v58  ;;  %v302_v19 = vld [vmem:[%s234_s8] sm:$0xff]  ;;  %v303_v23 = vld [vmem:[%s234_s8 + $0x8] sm:$0xff]  ;;  %v757_v24 = vld [vmem:[%s1293_s2 + $0x110] sm:$0xff] }
  0x12   : > { %v258_v31 = vrot.slane %v251_v26, %v1145_v21  ;;  %977 = vmatpush3.bf16.msra.mxu1 %v974_v25  ;;  %947 = vmatprep.subr.bf16.mxu0 %v946_v32  ;;  %v758_v25 = vld [vmem:[%s1293_s2 + $0x118] sm:$0xff]  ;;  %v760_v29 = vld [vmem:[%s1293_s2 + $0x128] sm:$0xff]  ;;  %v765_v37 = vld [vmem:[%s1293_s2 + $0x150] sm:$0xff] }
  0x13   : > { %979 = vmatprep.subr.bf16.mxu1 %v978_v34  ;;  %v1002_v28 = vpack.c.bf16 %v758_v25, %v757_v24  ;;  %v764_v35 = vld [vmem:[%s1293_s2 + $0x148] sm:$0xff]  ;;  %v766_v38 = vld [vmem:[%s1293_s2 + $0x158] sm:$0xff]  ;;  %v769_v43 = vld [vmem:[%s1293_s2 + $0x170] sm:$0xff] }
  0x14   : > { %v1161_v33 = vrot.slane %v258_v31, %v1145_v21  ;;  %v761_v31 = vld [vmem:[%s1293_s2 + $0x130] sm:$0xff]  ;;  %v768_v41 = vld [vmem:[%s1293_s2 + $0x168] sm:$0xff]  ;;  %v770_v44 = vld [vmem:[%s1293_s2 + $0x178] sm:$0xff] }
  0x15   : > { %949 = vmatpush3.bf16.msra.mxu0 %v946_v32  ;;  %v762_v32 = vld [vmem:[%s1293_s2 + $0x138] sm:$0xff] }
  0x16   : > { %267 = vrot.lane.b32.xlu0 %v1161_v33, %s1055_s16  ;;  %273 = vrot.lane.b32.xlu1 %v1161_v33, %s1056_s17 }
  0x17   : > { %981 = vmatpush3.bf16.msra.mxu1 %v978_v34  ;;  %951 = vmatprep.subr.bf16.mxu0 %v950_v39  ;;  %v763_v34 = vld [vmem:[%s1293_s2 + $0x140] sm:$0xff] }
  0x18   : > { %983 = vmatprep.subr.bf16.mxu1 %v982_v40  ;;  %v1014_v36 = vpack.c.bf16 %v764_v35, %v763_v34 }
  0x19   : > { %953 = vmatpush3.bf16.msra.mxu0 %v950_v39  ;;  %v1018_v39 = vpack.c.bf16 %v766_v38, %v765_v37 }
  0x1a   : > { %270 = vrot.lane.b32.xlu0 %v1161_v33, %s1057_s28  ;;  %276 = vrot.lane.b32.xlu1 %v1161_v33, %s1058_s29 }
  0x1b   : > { %985 = vmatpush3.bf16.msra.mxu1 %v982_v40  ;;  %955 = vmatprep.subr.bf16.mxu0 %v954_v45  ;;  %v767_v40 = vld [vmem:[%s1293_s2 + $0x160] sm:$0xff] }
  0x1c   : > { %987 = vmatprep.subr.bf16.mxu1 %v986_v48  ;;  %v1022_v42 = vpack.c.bf16 %v768_v41, %v767_v40 }
  0x1d   : > { %957 = vmatpush3.bf16.msra.mxu0 %v954_v45  ;;  %v1026_v45 = vpack.c.bf16 %v770_v44, %v769_v43 }
  0x1e   : > { %279 = vrot.lane.b32.xlu0 %v1161_v33, %s1059_s13  ;;  %282 = vrot.lane.b32.xlu1 %v1161_v33, %s1060_s14 }
  0x1f   : > { %959 = vmatprep.subr.bf16.mxu0 %v958_v51  ;;  %989 = vmatpush3.bf16.msra.mxu1 %v986_v48 }
  0x20   : > { %991 = vmatprep.subr.bf16.mxu1 %v990_v54 }
  0x21   : > { %961 = vmatpush3.bf16.msra.mxu0 %v958_v51 }
  0x22   : > { %285 = vrot.lane.b32.xlu0 %v1161_v33, %s1061_s25  ;;  %963 = vmatprep.subr.bf16.mxu0 %v962_v57 }
  0x23   : > { %993 = vmatpush3.bf16.msra.mxu1 %v990_v54 }
  0x24   : > { %995 = vmatprep.subr.bf16.mxu1 %v994_v60 }
  0x25   : > { %965 = vmatpush3.bf16.msra.mxu0 %v962_v57 }
  0x26   : > { %999 = vmatprep.subr.bf16.mxu0 %v998_v61 }
  0x27   : > { %997 = vmatpush3.bf16.msra.mxu1 %v994_v60 }
  0x88   : > { %v268_v62 = vpop.permute.xlu0 %267  ;;  %v274_v63 = vpop.permute.xlu1 %273 }
  0x89   : > { %v289_v0 = vsel %vm288_vm0, %v1161_v33, %v268_v62  ;;  %v1010_v33 = vpack.c.bf16 %v762_v32, %v761_v31 }
  0x8c   : > { %v271_v1 = vpop.permute.xlu0 %270  ;;  %v277_v2 = vpop.permute.xlu1 %276 }
  0x8d   : > { %v291_v3 = vsel %vm290_vm1, %v289_v0, %v271_v1  ;;  %v772_v0 = vld [vmem:[%s1295_s4] ss:$0 sm:$0xff] }
  0x8e   : > { %v293_v4 = vsel %vm292_vm2, %v291_v3, %v274_v63 }
  0x8f   : > { %v295_v5 = vsel %vm294_vm3, %v293_v4, %v277_v2 }
  0x90   : > { %v280_v6 = vpop.permute.xlu0 %279  ;;  %v283_v8 = vpop.permute.xlu1 %282 }
  0x91   : > { %v297_v7 = vsel %vm296_vm4, %v295_v5, %v280_v6 }
  0x92   : > { %v299_v10 = vsel %vm298_vm5, %v297_v7, %v283_v8 }
  0x94   : > { %v286_v11 = vpop.permute.xlu0 %285 }
  0x95   : > { %v301_v12 = vsel %vm300_vm6, %v299_v10, %v286_v11 }
  0x96   : > { %v311_v13 = vrot.slane %v301_v12, %v1145_v21 }
  0x98   : > { %v312_v14 = vcombine.high %v311_v13, %v311_v13  ;;  %v319_v15 = vrot.slane %v311_v13, %v1145_v21 }
  0x9a   : > { %v326_v17 = vrot.slane %v312_v14, %v1145_v21  ;;  %v329_v18 = vadd.f32 1.0, %v319_v15  ;;  %v759_v21 = vld [vmem:[%s1293_s2 + $0x120] sm:$0xff] }
  0x9b   : > { %v1006_v30 = vpack.c.bf16 %v760_v29, %v759_v21 }
  0x9c   : > { %v330_v20 = vadd.f32 1.0, %v326_v17  ;;  %v336_v22 = vrot.slane %v329_v18, %v335_v16 }
  0x9e   : > { %v343_v26 = vmul.f32 %v336_v22, %v302_v19  ;;  %v340_v27 = vrot.slane %v330_v20, %v335_v16 }
  0xa0   : > { %861 = vmatprep.mubr.f32.mxu0 %v343_v26  ;;  %896 = vmatprep.mubr.f32.mxu1 %v343_v26  ;;  %v344_v9 = vmul.f32 %v340_v27, %v303_v23 }
  0xa2   : > { %862 = vmatmul.mubr.f32.vlgmr.msra.gmra.mrb[0].mxu0 %v344_v9  ;;  %897 = vmatmul.mubr.f32.vlgmr.msra.gmra.mrb[0].mxu1 %v344_v9 }
  0xa3   : > { %1001 = vmatpush3.bf16.msra.mxu0 %v998_v61  ;;  %931 = vmatprep.mubr.f32.mxu0 %v343_v26  ;;  %v771_v61 = vld [vmem:[%s1294_s3] ss:$0 sm:$0xff] }
  0xa4   : > { %1003 = vmatprep.subr.bf16.mxu0 %v1002_v28 }
  0xa7   : > { %1005 = vmatpush3.bf16.msra.mxu0 %v1002_v28 }
  0xa8   : > { %1007 = vmatprep.subr.bf16.mxu0 %v1006_v30 }
  0xab   : > { %1009 = vmatpush3.bf16.msra.mxu0 %v1006_v30 }
  0xac   : > { %1011 = vmatprep.subr.bf16.mxu0 %v1010_v33 }
  0xaf   : > { %1013 = vmatpush3.bf16.msra.mxu0 %v1010_v33 }
  0xb0   : > { %1015 = vmatprep.subr.bf16.mxu0 %v1014_v36 }
  0xb3   : > { %1017 = vmatpush3.bf16.msra.mxu0 %v1014_v36 }
  0xb4   : > { %1019 = vmatprep.subr.bf16.mxu0 %v1018_v39 }
  0xb7   : > { %1021 = vmatpush3.bf16.msra.mxu0 %v1018_v39 }
  0xb8   : > { %1023 = vmatprep.subr.bf16.mxu0 %v1022_v42 }
  0xbb   : > { %1025 = vmatpush3.bf16.msra.mxu0 %v1022_v42 }
  0xbc   : > { %1027 = vmatprep.subr.bf16.mxu0 %v1026_v45 }
  0xbf   : > { %1029 = vmatpush3.bf16.msra.mxu0 %v1026_v45 }
  0xc2   : > { %932 = vmatmul.mubr.f32.vlgmr.msra.gmra.mrb[2].mxu0 %v344_v9 }
 0x175   : > { %v863_v46 = vpop.f32.mrb[0].mxu0  ;;  %v898_v47 = vpop.f32.mrb[0].mxu1 }
 0x176   : > { %v623_v48 = vrot.slane %v863_v46, 7  ;;  %v427_v49 = vpop.f32.mrb[1].mxu0  ;;  %v519_v50 = vpop.f32.mrb[1].mxu1 }
 0x177   : > { %v622_v51 = vrot.slane %v427_v49, 7 }
 0x178   : > { %v628_v52 = vsel %vm626_vm7, 0.0, %v623_v48 }
 0x179   : > { %v630_v53 = vadd.f32 %v898_v47, %v628_v52  ;;  %v627_v54 = vsel %vm626_vm7, 0.0, %v622_v51 }
 0x17a   : > { %v629_v55 = vadd.f32 %v627_v54, %v519_v50 }
 0x195   : > { %v933_v56 = vpop.f32.mrb[2].mxu0 }
 0x196   : > { %v634_v57 = vrot.slane %v933_v56, 1  ;;  %v611_v58 = vpop.f32.mrb[3].mxu0 }
 0x197   : > { %v633_v59 = vrot.slane %v611_v58, 1 }
 0x198   : > { %v639_v60 = vsel %vm637_vm8, %v634_v57, 0.0 }
 0x199   : > { %v641_v62 = vadd.f32 %v639_v60, %v630_v53  ;;  %v638_v63 = vsel %vm637_vm8, %v633_v59, 0.0 }
 0x19a   : > { %v640_v1 = vadd.f32 %v638_v63, %v629_v55 }
 0x19b   : > { %v650_v2 = vmul.f32 %v771_v61, %v641_v62 }
 0x19c   : > { %v649_v3 = vmul.f32 %v771_v61, %v640_v1 }
 0x19d   : > { %v659_v4 = vadd.f32 %v772_v0, %v650_v2 }
 0x19e   : > { %v658_v5 = vadd.f32 %v772_v0, %v649_v3 }
 0x19f   : > { %v661_v6 = vmax.f32 %v659_v4, 0.0 }
 0x1a0   : > { %v660_v7 = vmax.f32 %v658_v5, 0.0 }
 0x1a1   : > { %663 = vst [vmem:[%s245_s23 + $0x8] sm:$0xff] %v661_v6 }
 0x1a2   : > { %662 = vst [vmem:[%s245_s23] sm:$0xff] %v660_v7 }
 0x1a3 PF: > { %s15_s18 = sadd.s32 1, %s1052_s18  }
 0x1a4   : > { %p12_p4 = scmp.ge.s32.totalorder %s15_s18, 10  }
 0x1a6   :  { %14 = sbr.rel (!%p12_p4) target bundleno = 1 (0x1), region = 75 }

</bundles_post_ra>
